<compile_context>
chip_gen: v5e
topology: v5e:2x2
jax: 0.10.0
libtpu: 0.0.40
codegen_flags: <defaults>
</compile_context>

<pallas_src>
import functools
import math

import jax
import jax.numpy as jnp
import numpy as np
from jax.experimental import pallas as pl
from jax.experimental.pallas import tpu as pltpu


def _gelu_tanh(x):
    # tanh-approximate GELU (EUP tanh lowers on every TPU generation).
    # TODO(synk): nn.GELU() defaults to exact erf; tanh approximation kept for
    # guaranteed Mosaic lowering.  The pure-JAX reference uses the same formula.
    c = math.sqrt(2.0 / math.pi)
    return 0.5 * x * (1.0 + jnp.tanh(c * (x + 0.044715 * x * x * x)))


def _probe_single_buffered():
    """Feature probe (done once): does this build support pl.Buffered(1) specs?"""
    if not hasattr(pl, "Buffered"):
        return False
    try:
        pl.BlockSpec((8, 128), lambda i: (0, 0), pipeline_mode=pl.Buffered(1))
    except (TypeError, ValueError):
        return False
    return True


_SINGLE_BUFFER_WEIGHTS = {"ok": _probe_single_buffered()}


def _lora_adapter_kernel(x_ref, w1_ref, b1_ref, adp_id_ref, gate_flag_ref, w2_ref,
                         o_ref, *, num_adapter, top_k):
    """One token tile.

    x_ref         (TM, H)   compute dtype (bf16 recommended)
    w1_ref        (H, WT)   fused [dense1 | gate | zero-pad] weight
    b1_ref        (1, WT)   fused bias (f32)
    adp_id_ref    (1, WT)   adapter id per fused column (f32; == num_adapter on pad)
    gate_flag_ref (1, WT)   1.0 on gate-logit columns, else 0.0
    w2_ref        (WT, H)   fused [dense2 ; b2 rows ; zero-pad], pre-scaled by
                            scaling / top_k
    """
    neg = jnp.float32(-1e30)   # finite "-inf" (avoids inf*0 -> NaN anywhere)

    # ---- fused dense1 + gate projection: ONE MXU matmul, f32 accumulation --------
    hg = jnp.dot(x_ref[...], w1_ref[...], preferred_element_type=jnp.float32)
    hg = hg + b1_ref[...]                                      # (TM, WT) f32

    adp_id = adp_id_ref[...]                                   # (1, WT)
    is_gate = gate_flag_ref[...] > 0.0                         # (1, WT)

    # ---- NaiveGate top-k over the gate columns -> per-column selection mask ------
    gl = jnp.where(is_gate, hg, neg)                           # (TM, WT)
    mask = jnp.zeros(hg.shape, jnp.float32)
    for _ in range(top_k):                                     # static unroll, K tiny
        m = jnp.max(gl, axis=-1, keepdims=True)                # (TM, 1)
        # Ties pick the smallest adapter index; torch.topk tie order is
        # implementation-defined, so only exact-tie cases can differ.
        sel = jnp.min(jnp.where(gl == m, adp_id, jnp.float32(num_adapter)),
                      axis=-1, keepdims=True)                  # (TM, 1)
        hit = (adp_id == sel).astype(jnp.float32)              # whole adapter's columns
        mask = mask + hit
        gl = jnp.where(hit > 0.0, neg, gl)                     # knock adapter out

    # ---- fused dense2 + bias: ONE (TM, WT) @ (WT, H) matmul ----------------------
    # Hidden columns carry gelu(h); gate columns carry 1.0 so the mask routes the
    # matching (pre-scaled) b2 bias row; padded columns are zero either way.
    value = jnp.where(is_gate, jnp.float32(1.0), _gelu_tanh(hg))
    h_sel = (value * mask).astype(w2_ref.dtype)
    y = jnp.dot(h_sel, w2_ref[...], preferred_element_type=jnp.float32)
    o_ref[...] = y.astype(o_ref.dtype)


def prepare_lora_weights(params, *, num_adapter, inter_size, hidden_size, top_k,
                         scaling=2.0, compute_dtype=jnp.bfloat16):
    """One-time host-side weight fusion (call at load time, not per forward).

    compute_dtype=bf16 halves HBM weight streams and feeds the MXU natively on
    v5e/v6e/v7x (v7x has no int MXU; use fp8 there / int8 on v5e-v6e if quantizing).
    """
    A, I, H = num_adapter, inter_size, hidden_size
    AI = A * I
    WT = ((AI + A + 127) // 128) * 128          # lane-aligned fused width
    pad = WT - (AI + A)

    f32 = jnp.float32
    w1 = params["w1"].astype(f32)               # (H, AI)
    wg = params["wg"].astype(f32)               # (H, A)
    b1 = params["b1"].reshape(1, AI).astype(f32)
    bg = params["bg"].reshape(1, A).astype(f32)
    w2 = params["w2"].reshape(AI, H).astype(f32)    # adapter-major rows
    b2 = params["b2"].astype(f32)               # (A, H)

    s = scaling / top_k                         # folded: no epilogue multiply
    w1g = jnp.concatenate([w1, wg, jnp.zeros((H, pad), f32)], axis=1)
    b1g = jnp.concatenate([b1, bg, jnp.zeros((1, pad), f32)], axis=1)
    w2f = jnp.concatenate([w2 * s, b2 * s, jnp.zeros((pad, H), f32)], axis=0)

    col = np.arange(WT)
    adp_id = np.where(col < AI, col // I,
                      np.where(col < AI + A, col - AI, A)).astype(np.float32)
    gate_flag = ((col >= AI) & (col < AI + A)).astype(np.float32)

    return {
        "w1g": w1g.astype(compute_dtype),
        "b1g": b1g,                              # biases stay f32 (added post-accum)
        "w2f": w2f.astype(compute_dtype),
        "adp_id": jnp.asarray(adp_id).reshape(1, WT),
        "gate_flag": jnp.asarray(gate_flag).reshape(1, WT),
        "num_adapter": num_adapter,
        "top_k": top_k,
    }


def lora_adapter_forward(x, fused, *, tm=512, vmem_limit_bytes=None):
    """x: (B, L, H) -> (B, L, H).  `fused` comes from prepare_lora_weights().

    tm: token tile (rows per grid step).  512 is the default for v6e/v7x
    (per-grid-step overhead ~0.35us makes 128 leave >2x on the table); sweep
    256-384 on v5e.  Rounded up to a multiple of 8; partial tail tile is masked.
    """
    B, L, H = x.shape
    N = B * L
    WT = fused["w1g"].shape[1]
    compute_dtype = fused["w1g"].dtype
    out_dtype = x.dtype

    tm = max(8, ((min(int(tm), N) + 7) // 8) * 8)
    grid = (pl.cdiv(N, tm),)

    if vmem_limit_bytes is None:
        # <= 3/4 of physical VMEM, capped at 64 MiB: 64 MiB on v5e/v6e (128 MiB
        # physical), 48 MiB on v7x (64 MiB physical) to keep compiler headroom.
        try:
            cap = pltpu.get_tpu_info().vmem_capacity_bytes
        except Exception:    # info query only; fall back to v5e/v6e capacity
            cap = 128 * 1024 * 1024
        vmem_limit_bytes = int(min(64 * 1024 * 1024, (cap * 3) // 4))

    kernel = functools.partial(_lora_adapter_kernel,
                               num_adapter=fused["num_adapter"],
                               top_k=fused["top_k"])

    def build(single_buffer_weights):
        def wspec(shape):
            imap = lambda *_: (0,) * len(shape)
            if single_buffer_weights:
                # Constant index_map => single-buffer halves resident weight VMEM.
                return pl.BlockSpec(shape, imap, pipeline_mode=pl.Buffered(1))
            return pl.BlockSpec(shape, imap)

        return pl.pallas_call(
            kernel,
            out_shape=jax.ShapeDtypeStruct((N, H), out_dtype),
            grid=grid,
            in_specs=[
                pl.BlockSpec((tm, H), lambda i: (i, 0)),   # x token tile
                wspec((H, WT)),                            # [W1 | Wg | pad]
                wspec((1, WT)),                            # [b1 | bg | pad]
                wspec((1, WT)),                            # adapter id per column
                wspec((1, WT)),                            # gate-column flag
                wspec((WT, H)),                            # [W2 ; b2 ; pad] pre-scaled
            ],
            out_specs=pl.BlockSpec((tm, H), lambda i: (i, 0)),
            compiler_params=pltpu.CompilerParams(
                # TODO(synk): on v7x verify the token grid shards across both
                # TensorCores; switch to pltpu.CORE_PARALLEL if "parallel" doesn't.
                dimension_semantics=("parallel",),
                vmem_limit_bytes=vmem_limit_bytes),
        )

    xf = x.reshape(N, H).astype(compute_dtype)   # in production, feed bf16 x directly
    args = (xf, fused["w1g"], fused["b1g"], fused["adp_id"], fused["gate_flag"],
            fused["w2f"])

    if _SINGLE_BUFFER_WEIGHTS["ok"]:
        try:
            out = build(True)(*args)
        except pltpu.LoweringException:
            # Narrow fallback: build has pl.Buffered but rejects buffer_count=1.
            _SINGLE_BUFFER_WEIGHTS["ok"] = False
            out = build(False)(*args)
    else:
        out = build(False)(*args)
    return out.reshape(B, L, H)


def lora_adapter_ref(x, params, *, num_adapter, inter_size, top_k, scaling=2.0):
    """Pure-JAX reference mirroring the PyTorch forward (use_gate=True, eval)."""
    B, L, H = x.shape
    h = _gelu_tanh(x @ params["w1"] + params["b1"].reshape(-1))
    h = h.reshape(B, L, num_adapter, inter_size)
    y = jnp.einsum("blai,aih->blah", h, params["w2"]) + params["b2"][None, None]
    g = x @ params["wg"] + params["bg"].reshape(-1)
    _, idx = jax.lax.top_k(g, top_k)             # gate softmax scores unused by forward
    sel = jnp.take_along_axis(y, idx[..., None], axis=2)
    return sel.sum(axis=2) / top_k * scaling


if __name__ == "__main__":
    # Small config: B=2, L=80 (N=160), hidden=128, adp_intermediate=32,
    # num_adapter=4, top_k=2.  Fused width WT = round_up(4*32 + 4, 128) = 256.
    B, L, H, I, A, K = 2, 80, 128, 32, 4, 2
    SCALING = 2.0

    key = jax.random.PRNGKey(0)
    k_x, k_w1, k_w2, k_b2, k_wg = jax.random.split(key, 5)
    x = jax.random.normal(k_x, (B, L, H), dtype=jnp.float32)

    # dense1 / gate: kaiming-uniform style bound, zero bias (reset_lora_parameters);
    # PyTorch zero-inits dense2, so small random values keep the test non-trivial.
    bound1 = 1.0 / math.sqrt(H)
    params = {
        "w1": jax.random.uniform(k_w1, (H, A * I), jnp.float32, -bound1, bound1),
        "b1": jnp.zeros((1, A * I), jnp.float32),
        "w2": 0.05 * jax.random.normal(k_w2, (A, I, H), dtype=jnp.float32),
        "b2": 0.01 * jax.random.normal(k_b2, (A, H), dtype=jnp.float32),
        "wg": jax.random.uniform(k_wg, (H, A), jnp.float32, -bound1, bound1),
        "bg": jnp.zeros((1, A), jnp.float32),
    }

    def gate_safe_mask(xv, wg, bg, thresh=1e-4):
        # Tokens whose k-th / (k+1)-th gate-logit margin is tiny can legitimately
        # pick different adapters under reordered accumulation; exclude them.
        g = xv @ wg + bg.reshape(-1)
        gs = jnp.sort(g, axis=-1)[..., ::-1]
        return (gs[..., K - 1] - gs[..., K]) > thresh

    def check(out, ref, safe, atol, rtol):
        diff = jnp.abs(out - ref)
        ok = (diff <= atol + rtol * jnp.abs(ref)) | (~safe)[..., None]
        assert bool(jnp.all(ok)), f"max abs err {float(jnp.max(diff))}"

    # ---- Run 1: f32 compute, tm=128 (exercises the masked partial tail tile) ------
    fused32 = prepare_lora_weights(params, num_adapter=A, inter_size=I, hidden_size=H,
                                   top_k=K, scaling=SCALING,
                                   compute_dtype=jnp.float32)
    out32 = jax.block_until_ready(lora_adapter_forward(x, fused32, tm=128))
    ref32 = lora_adapter_ref(x, params, num_adapter=A, inter_size=I,
                             top_k=K, scaling=SCALING)
    assert out32.shape == (B, L, H)
    check(out32, ref32, gate_safe_mask(x, params["wg"], params["bg"]), 1e-4, 1e-4)

    # ---- Run 2: bf16 MXU operands / HBM streams (production default), tm=512 ------
    fusedbf = prepare_lora_weights(params, num_adapter=A, inter_size=I, hidden_size=H,
                                   top_k=K, scaling=SCALING,
                                   compute_dtype=jnp.bfloat16)
    outbf = jax.block_until_ready(lora_adapter_forward(x, fusedbf))
    # Compare against the reference on bf16-rounded operands so the discrete gate
    # selection matches; remaining delta is bf16 activation rounding only.
    rp = dict(params)
    for name in ("w1", "w2", "b2", "wg"):
        rp[name] = params[name].astype(jnp.bfloat16).astype(jnp.float32)
    xr = x.astype(jnp.bfloat16).astype(jnp.float32)
    refbf = lora_adapter_ref(xr, rp, num_adapter=A, inter_size=I,
                             top_k=K, scaling=SCALING)
    check(outbf, refbf, gate_safe_mask(xr, rp["wg"], rp["bg"]), 3e-2, 3e-2)

    print("KERNEL_OK")
</pallas_src>

<mosaic_0001>
module attributes {stable_mosaic.version = 11 : i64} {
  func.func @_lora_adapter_kernel(%arg0: i32, %arg1: memref<128x128xf32, #tpu.memory_space<vmem>>, %arg2: memref<128x256xf32, #tpu.memory_space<vmem>>, %arg3: memref<1x256xf32, #tpu.memory_space<vmem>>, %arg4: memref<1x256xf32, #tpu.memory_space<vmem>>, %arg5: memref<1x256xf32, #tpu.memory_space<vmem>>, %arg6: memref<256x128xf32, #tpu.memory_space<vmem>>, %arg7: memref<128x128xf32, #tpu.memory_space<vmem>>) attributes {dimension_semantics = [#tpu.dimension_semantics<parallel>], iteration_bounds = array<i64: 2>, scalar_prefetch = 0 : i64, scratch_operands = 0 : i64, tpu.core_type = #tpu.core_type<tc>, window_params = [{transform_indices = @transform_0, window_bounds = array<i64: 128, 128>}, {pipeline_mode = #tpu.pipeline_mode<synchronous>, transform_indices = @transform_1, window_bounds = array<i64: 128, 256>}, {pipeline_mode = #tpu.pipeline_mode<synchronous>, transform_indices = @transform_2, window_bounds = array<i64: 1, 256>}, {pipeline_mode = #tpu.pipeline_mode<synchronous>, transform_indices = @transform_3, window_bounds = array<i64: 1, 256>}, {pipeline_mode = #tpu.pipeline_mode<synchronous>, transform_indices = @transform_4, window_bounds = array<i64: 1, 256>}, {pipeline_mode = #tpu.pipeline_mode<synchronous>, transform_indices = @transform_5, window_bounds = array<i64: 256, 128>}, {transform_indices = @transform_6, window_bounds = array<i64: 128, 128>}]} {
    %c0 = arith.constant 0 : index
    %c0_0 = arith.constant 0 : index
    %0 = vector.load %arg1[%c0, %c0_0] : memref<128x128xf32, #tpu.memory_space<vmem>>, vector<128x128xf32>
    %c0_1 = arith.constant 0 : index
    %c0_2 = arith.constant 0 : index
    %1 = vector.load %arg2[%c0_1, %c0_2] : memref<128x256xf32, #tpu.memory_space<vmem>>, vector<128x256xf32>
    %cst = arith.constant dense<0.000000e+00> : vector<128x256xf32>
    %2 = tpu.matmul %0, %1, %cst {dimension_numbers = #tpu.dot_dimension_numbers<[1], [0], [0], [1], [0, 0, 1, 1], [], []>} : vector<128x128xf32>, vector<128x256xf32>, vector<128x256xf32> -> vector<128x256xf32>
    %c0_3 = arith.constant 0 : index
    %c0_4 = arith.constant 0 : index
    %3 = vector.load %arg3[%c0_3, %c0_4] : memref<1x256xf32, #tpu.memory_space<vmem>>, vector<1x256xf32>
    %4 = vector.broadcast %3 : vector<1x256xf32> to vector<128x256xf32>
    %5 = arith.addf %2, %4 : vector<128x256xf32>
    %c0_5 = arith.constant 0 : index
    %c0_6 = arith.constant 0 : index
    %6 = vector.load %arg4[%c0_5, %c0_6] : memref<1x256xf32, #tpu.memory_space<vmem>>, vector<1x256xf32>
    %c0_7 = arith.constant 0 : index
    %c0_8 = arith.constant 0 : index
    %7 = vector.load %arg5[%c0_7, %c0_8] : memref<1x256xf32, #tpu.memory_space<vmem>>, vector<1x256xf32>
    %cst_9 = arith.constant 0.000000e+00 : f32
    %8 = vector.broadcast %cst_9 : f32 to vector<1x256xf32>
    %9 = arith.cmpf ogt, %7, %8 : vector<1x256xf32>
    %cst_10 = arith.constant -1.000000e+30 : f32
    %10 = vector.shape_cast %9 : vector<1x256xi1> to vector<1x256xi1>
    %11 = vector.broadcast %10 : vector<1x256xi1> to vector<128x256xi1>
    %12 = vector.broadcast %cst_10 : f32 to vector<128x256xf32>
    %13 = arith.select %11, %5, %12 : vector<128x256xi1>, vector<128x256xf32>
    %cst_11 = arith.constant 0.000000e+00 : f32
    %14 = vector.broadcast %cst_11 : f32 to vector<128x256xf32>
    %cst_12 = arith.constant dense<0xFF800000> : vector<128xf32>
    %15 = vector.multi_reduction <maximumf>, %13, %cst_12 [1] : vector<128x256xf32> to vector<128xf32>
    %16 = vector.shape_cast %15 : vector<128xf32> to vector<128x1xf32>
    %17 = vector.broadcast %16 : vector<128x1xf32> to vector<128x256xf32>
    %18 = arith.cmpf oeq, %13, %17 : vector<128x256xf32>
    %cst_13 = arith.constant 4.000000e+00 : f32
    %19 = vector.shape_cast %6 : vector<1x256xf32> to vector<1x256xf32>
    %20 = vector.broadcast %19 : vector<1x256xf32> to vector<128x256xf32>
    %21 = vector.broadcast %cst_13 : f32 to vector<128x256xf32>
    %22 = arith.select %18, %20, %21 : vector<128x256xi1>, vector<128x256xf32>
    %cst_14 = arith.constant dense<0x7F800000> : vector<128xf32>
    %23 = vector.multi_reduction <minimumf>, %22, %cst_14 [1] : vector<128x256xf32> to vector<128xf32>
    %24 = vector.shape_cast %23 : vector<128xf32> to vector<128x1xf32>
    %25 = vector.broadcast %6 : vector<1x256xf32> to vector<128x256xf32>
    %26 = vector.broadcast %24 : vector<128x1xf32> to vector<128x256xf32>
    %27 = arith.cmpf oeq, %25, %26 : vector<128x256xf32>
    %28 = arith.extui %27 : vector<128x256xi1> to vector<128x256xi32>
    %29 = arith.sitofp %28 : vector<128x256xi32> to vector<128x256xf32>
    %30 = arith.addf %14, %29 : vector<128x256xf32>
    %cst_15 = arith.constant 0.000000e+00 : f32
    %31 = vector.broadcast %cst_15 : f32 to vector<128x256xf32>
    %32 = arith.cmpf ogt, %29, %31 : vector<128x256xf32>
    %cst_16 = arith.constant -1.000000e+30 : f32
    %33 = vector.broadcast %cst_16 : f32 to vector<128x256xf32>
    %34 = arith.select %32, %33, %13 : vector<128x256xi1>, vector<128x256xf32>
    %cst_17 = arith.constant dense<0xFF800000> : vector<128xf32>
    %35 = vector.multi_reduction <maximumf>, %34, %cst_17 [1] : vector<128x256xf32> to vector<128xf32>
    %36 = vector.shape_cast %35 : vector<128xf32> to vector<128x1xf32>
    %37 = vector.broadcast %36 : vector<128x1xf32> to vector<128x256xf32>
    %38 = arith.cmpf oeq, %34, %37 : vector<128x256xf32>
    %cst_18 = arith.constant 4.000000e+00 : f32
    %39 = vector.shape_cast %6 : vector<1x256xf32> to vector<1x256xf32>
    %40 = vector.broadcast %39 : vector<1x256xf32> to vector<128x256xf32>
    %41 = vector.broadcast %cst_18 : f32 to vector<128x256xf32>
    %42 = arith.select %38, %40, %41 : vector<128x256xi1>, vector<128x256xf32>
    %cst_19 = arith.constant dense<0x7F800000> : vector<128xf32>
    %43 = vector.multi_reduction <minimumf>, %42, %cst_19 [1] : vector<128x256xf32> to vector<128xf32>
    %44 = vector.shape_cast %43 : vector<128xf32> to vector<128x1xf32>
    %45 = vector.broadcast %6 : vector<1x256xf32> to vector<128x256xf32>
    %46 = vector.broadcast %44 : vector<128x1xf32> to vector<128x256xf32>
    %47 = arith.cmpf oeq, %45, %46 : vector<128x256xf32>
    %48 = arith.extui %47 : vector<128x256xi1> to vector<128x256xi32>
    %49 = arith.sitofp %48 : vector<128x256xi32> to vector<128x256xf32>
    %50 = arith.addf %30, %49 : vector<128x256xf32>
    %cst_20 = arith.constant 5.000000e-01 : f32
    %51 = vector.broadcast %cst_20 : f32 to vector<128x256xf32>
    %52 = arith.mulf %51, %5 : vector<128x256xf32>
    %cst_21 = arith.constant 4.471500e-02 : f32
    %53 = vector.broadcast %cst_21 : f32 to vector<128x256xf32>
    %54 = arith.mulf %53, %5 : vector<128x256xf32>
    %55 = arith.mulf %54, %5 : vector<128x256xf32>
    %56 = arith.mulf %55, %5 : vector<128x256xf32>
    %57 = arith.addf %5, %56 : vector<128x256xf32>
    %cst_22 = arith.constant 0.797884583 : f32
    %58 = vector.broadcast %cst_22 : f32 to vector<128x256xf32>
    %59 = arith.mulf %58, %57 : vector<128x256xf32>
    %60 = math.tanh %59 : vector<128x256xf32>
    %cst_23 = arith.constant 1.000000e+00 : f32
    %61 = vector.broadcast %cst_23 : f32 to vector<128x256xf32>
    %62 = arith.addf %61, %60 : vector<128x256xf32>
    %63 = arith.mulf %52, %62 : vector<128x256xf32>
    %cst_24 = arith.constant 1.000000e+00 : f32
    %64 = vector.shape_cast %9 : vector<1x256xi1> to vector<1x256xi1>
    %65 = vector.broadcast %64 : vector<1x256xi1> to vector<128x256xi1>
    %66 = vector.broadcast %cst_24 : f32 to vector<128x256xf32>
    %67 = arith.select %65, %66, %63 : vector<128x256xi1>, vector<128x256xf32>
    %68 = arith.mulf %67, %50 : vector<128x256xf32>
    %c0_25 = arith.constant 0 : index
    %c0_26 = arith.constant 0 : index
    %69 = vector.load %arg6[%c0_25, %c0_26] : memref<256x128xf32, #tpu.memory_space<vmem>>, vector<256x128xf32>
    %cst_27 = arith.constant dense<0.000000e+00> : vector<128x128xf32>
    %70 = tpu.matmul %68, %69, %cst_27 {dimension_numbers = #tpu.dot_dimension_numbers<[1], [0], [0], [1], [0, 0, 1, 1], [], []>} : vector<128x256xf32>, vector<256x128xf32>, vector<128x128xf32> -> vector<128x128xf32>
    %c0_28 = arith.constant 0 : index
    %c0_29 = arith.constant 0 : index
    %71 = vector.load %arg7[%c0_28, %c0_29] : memref<128x128xf32, #tpu.memory_space<vmem>>, vector<128x128xf32>
    tpu.vector_store %arg7[%c0_28, %c0_29], %70 {strides = array<i32>} : memref<128x128xf32, #tpu.memory_space<vmem>>, vector<128x128xf32>,
    return
  }
  func.func @transform_0(%arg0: i32) -> (i32, i32) {
    %c0_i32 = arith.constant 0 : i32
    %c0_i32_0 = arith.constant 0 : i32
    return %arg0, %c0_i32 : i32, i32
  }
  func.func @transform_1(%arg0: i32) -> (i32, i32) {
    %c0_i32 = arith.constant 0 : i32
    %c0_i32_0 = arith.constant 0 : i32
    %c0_i32_1 = arith.constant 0 : i32
    return %c0_i32, %c0_i32_0 : i32, i32
  }
  func.func @transform_2(%arg0: i32) -> (i32, i32) {
    %c0_i32 = arith.constant 0 : i32
    %c0_i32_0 = arith.constant 0 : i32
    %c0_i32_1 = arith.constant 0 : i32
    return %c0_i32, %c0_i32_0 : i32, i32
  }
  func.func @transform_3(%arg0: i32) -> (i32, i32) {
    %c0_i32 = arith.constant 0 : i32
    %c0_i32_0 = arith.constant 0 : i32
    %c0_i32_1 = arith.constant 0 : i32
    return %c0_i32, %c0_i32_0 : i32, i32
  }
  func.func @transform_4(%arg0: i32) -> (i32, i32) {
    %c0_i32 = arith.constant 0 : i32
    %c0_i32_0 = arith.constant 0 : i32
    %c0_i32_1 = arith.constant 0 : i32
    return %c0_i32, %c0_i32_0 : i32, i32
  }
  func.func @transform_5(%arg0: i32) -> (i32, i32) {
    %c0_i32 = arith.constant 0 : i32
    %c0_i32_0 = arith.constant 0 : i32
    %c0_i32_1 = arith.constant 0 : i32
    return %c0_i32, %c0_i32_0 : i32, i32
  }
  func.func @transform_6(%arg0: i32) -> (i32, i32) {
    %c0_i32 = arith.constant 0 : i32
    %c0_i32_0 = arith.constant 0 : i32
    return %arg0, %c0_i32 : i32, i32
  }
}

</mosaic_0001>

<bundles_post_ra>
// kernel: tpu_custom_call.1
= control target key start
LH: loop header
LB: loop body
LE: loop exit
PB: predicated region body
PF: predicated region fallthrough
CT: control target
= control target key end

     0   :  { %s3760_s0 = inlined_call_operand.hbm [shape: f32[160,128], index: 0, kind: input, shape index: {}]   ;;  %s3761_s1 = inlined_call_operand.hbm [shape: f32[128,256], index: 1, kind: input, shape index: {}]   ;;  %s3762_s2 = inlined_call_operand.hbm [shape: f32[1,256], index: 2, kind: input, shape index: {}]   ;;  %s3763_s3 = inlined_call_operand.vmem [shape: f32[1,256], index: 3, kind: input, shape index: {}]   ;;  %s3764_s4 = inlined_call_operand.hbm [shape: f32[1,256], index: 4, kind: input, shape index: {}]   ;;  %s3765_s5 = inlined_call_operand.hbm [shape: f32[256,128], index: 5, kind: input, shape index: {}]   ;;  %s3766_s6 = inlined_call_operand.hbm [shape: f32[160,128], index: 6, kind: output, shape index: {}]  }
   0x1   :  { %3836 = sst [smem:[#allocation62_spill]] %s3761_s1 }
   0x2   :  { %3837 = sst [smem:[#allocation63_spill]] %s3764_s4 }
   0x3   :  { %11 = vsyncpa [#allocation3], 0 }
   0x4   :  { %13 = vsyncpa [#allocation3 + $0x1], 0 }
   0x5   :  { %14 = vsyncpa [#allocation6], 0 }
   0x6   :  { %15 = vsyncpa [#allocation9], 0 }
   0x7   :  { %16 = vsyncpa [#allocation4], 0 }
   0x8   :  { %18 = vsyncpa [#allocation4 + $0x1], 0  ;;  %s2431_s21 = smov 0   ;;  %s2433_s22 = smov 0  }
   0x9   :  { %s2435_s23 = smov 0   ;;  %s2437_s24 = smov 0  }
   0xa LB: > { %s2452_s25 = sadd.s32 4294967295, %s2378_s24   ;;  %s1884_s26 = sadd.s32 4294967294, %s2378_s24   ;;  %s2378_s24 = sphi %s2437_s24, %s3949_s24   ;;  %s2374_s23 = sphi %s2435_s23, %s3953_s23   ;;  %s2370_s22 = sphi %s2433_s22, %s3952_s22   ;;  %s2366_s21 = sphi %s2431_s21, %s3951_s21  }
   0xb   : > { %s2456_s27 = sadd.s32 1, %s2378_s24   ;;  %s31_s28 = sadd.s32 1, %s2374_s23 }
   0xc   : > { %3838 = sst [smem:[#allocation16_spill]] %s2456_s27  ;;  %s28_s29 = ssub.s32 %s2378_s24, %s2456_s27 }
   0xd   : > { %p38_p0 = scmp.ne.s32.totalorder %s2374_s23, %s2370_s22  ;;  %p29_p1 = scmp.eq.s32.totalorder %s28_s29, 0 }
   0xe   : > { %p39_p2 = scmp.eq.s32.totalorder %s2378_s24, 0  ;;  %p44_p3 = scmp.ne.s32.totalorder %s2370_s22, %s2366_s21 }
   0xf   : > { %p3770_p4 = scmp.eq.s32.totalorder %s2452_s25, 0  ;;  %p173_p7 = scmp.eq.s32.totalorder %s2452_s25, 1 }
  0x10   : > { %s2468_s30 = scalar_select %p29_p1, %s2374_s23, %s31_s28  }
  0x11   : > { %p2470_p5 = por %p39_p2, %p38_p0  ;;  %p2476_p6 = por %p3770_p4, %p44_p3 }
  0x12   : > { %3839 = sst [smem:[#allocation17_spill]] %s2468_s30  ;;  %p179_p8 = scmp.eq.s32.totalorder %s1884_s26, 1 }
  0x13   : > { %p1885_p9 = scmp.ge.s32.totalorder %s2378_s24, 1  ;;  %p186_p10 = scmp.lt.s32.totalorder %s2378_s24, 3 }
  0x14   : > { %p2483_p11 = por %p173_p7, %p38_p0  ;;  %p2487_p12 = por %p179_p8, %p44_p3 }
  0x15   : > { %p2491_p13 = pnand %p1885_p9, %p186_p10  ;;  %s3845_s1 = sld [smem:[#allocation62_spill]] }
  0x16   : > { %s3843_s10 = scalar_select %p2487_p12, 1, 0 }
  0x17   : > { %p1998_p1 = pneg %p2491_p13  ;;  %s2380_s15 = smov [#allocation5]  }
  0x18   : > { %s199_s16 = sshll.u32 %s2380_s15, 4  ;;  %s3847_s4 = sld [smem:[#allocation63_spill]]  ;;  %s200_s16 = int_to_ptr.vmem [resolvable:$true] %s199_s16 }
  0x19   : > { %p2502_p0 = pnand %p1998_p1, %p3770_p4  ;;  %s2381_s26 = smov 256  }
  0x1a   : > { %s2382_s28 = smov 16   ;;  %s212_s13 = sshll.u32 %s3762_s2, 4  ;;  %s213_s13 = int_to_ptr.hbm [resolvable:$true] %s212_s13 }
  0x1b   : > { %s197_s14 = sshll.u32 %s3845_s1, 4  ;;  %s2383_s15 = smov [#allocation8]   ;;  %s198_s14 = int_to_ptr.hbm [resolvable:$true] %s197_s14 }
  0x1c   : > { %2001 = dma.hbm_to_vmem [thread:$0]  (!%p2502_p0), %s198_s14, 4096, %s200_s16, [#allocation6], %s2381_s26, %s2381_s26, %s2382_s28  }
  0x1d   : > { %s229_s1 = sshll.u32 %s2383_s15, 4  ;;  %s2384_s18 = smov [#allocation7]   ;;  %s230_s1 = int_to_ptr.vmem [resolvable:$true] %s229_s1 }
  0x1e   : > { %s227_s20 = sshll.u32 %s3847_s4, 4  ;;  %s214_s19 = sshll.u32 %s2384_s18, 4  ;;  %s228_s20 = int_to_ptr.hbm [resolvable:$true] %s227_s20  ;;  %s215_s19 = int_to_ptr.vmem [resolvable:$true] %s214_s19 }
  0x1f   : > { %2007 = dma.hbm_to_vmem [thread:$0]  (!%p2502_p0), %s228_s20, 32, %s230_s1, [#allocation9]  }
  0x20   : > { %s238_s27 = sshll.u32 %s3765_s5, 4  ;;  %s2385_s14 = smov [#allocation10]   ;;  %s239_s27 = int_to_ptr.hbm [resolvable:$true] %s238_s27 }
  0x21   : > { %2004 = dma.hbm_to_vmem [thread:$0]  (!%p2502_p0), %s213_s13, 32, %s215_s19, [#allocation6]  }
  0x22   : > { %s240_s16 = sshll.u32 %s2385_s14, 4  ;;  %s2386_s26 = smov 128   ;;  %s241_s16 = int_to_ptr.vmem [resolvable:$true] %s240_s16 }
  0x23   : > { %s2387_s28 = smov 8   ;;  %p3769_p2 = scmp.ge.s32.totalorder %s2378_s24, 2 }
  0x24   : > { %2010 = dma.hbm_to_vmem [thread:$0]  (!%p2502_p0), %s239_s27, 4096, %s241_s16, [#allocation9], %s2386_s26, %s2386_s26, %s2387_s28  }
  0x25   : > { %250 = sbr.rel (%p3769_p2) target bundleno = 78 (0x4e), region = 36 }
  0x2a   : > { %253 = sbr.rel (!%p2470_p5) target bundleno = 78 (0x4e), region = 40  ;;  %s254_s1 = sand.u32 (%p2470_p5), 1, %s2374_s23  }
  0x2b   : > { %s1892_s4 = sshll.u32 (%p2470_p5), %s2378_s24, 4  ;;  %s1891_s30 = sshll.u32 (%p2470_p5), %s254_s1, 7 }
  0x2c   : > { %s260_s20 = ssub.s32 (%p2470_p5), 20, %s1892_s4  ;;  %s2533_s12 = scalar_lea.sflag (%p2470_p5), [#allocation3], %s254_s1 }
  0x2d   : > { %p261_p3 = scmp.lt.s32.totalorder (%p2470_p5), %s260_s20, 16  ;;  %s258_s13 = scalar_lea.vmem (%p2470_p5), [#allocation2], %s1891_s30 }
  0x2f   : > { %s3955_s20 = smov (!%p261_p3, %s260_s20), 16 }
  0x30   : > { %s1893_s17 = sshll.u32 %s3955_s20, 3 }
  0x31   : > { %s264_s27 = ssub.s32 128, %s1893_s17 }
  0x32   : > { %s265_s29 = sshll.u32 %s264_s27, 4 }
  0x33   : > { %266 = vsyncadd %s2533_s12, %s265_s29  ;;  %p2536_p5 = scmp.ne.s32.totalorder %s1893_s17, 0  ;;  %s1978_s15 = sshll.u32 %s2378_s24, 7 }
  0x34   : > { %s269_s14 = scalar_lea.hbm %s3760_s0, %s1978_s15  ;;  %s2544_s16 = sshll.u32 %s258_s13, 4  ;;  %s274_s16 = int_to_ptr.vmem [resolvable:$true] %s2544_s16 }
  0x35   : > { %s271_s26 = sshll.u32 %s269_s14, 4  ;;  %s1897_s28 = sshll.u32 %s3955_s20, 7  ;;  %s2547_s26 = int_to_ptr.hbm [resolvable:$true] %s271_s26 }
  0x36   : > { %s2254_s1 = sshra.s32 %s2547_s26, 4  ;;  %s2256_s4 = sshrl.u32 %s1897_s28, 4  ;;  %s2255_s1 = int_to_ptr.hbm [resolvable:$true] %s2254_s1 }
  0x37   : > { %s2261_s30 = scalar_lea.hbm %s2255_s1, %s2256_s4  ;;  %s2265_s29 = scalar_lea.hbm %s3760_s0, 160 }
  0x38   : > { %p2262_p7 = scmp.ne.s32.totalorder %s2255_s1, %s2261_s30  ;;  %p2266_p10 = scmp.lt.s32.totalorder %s2255_s1, %s3760_s0 }
  0x39   : > { %p2267_p1 = scmp.lt.s32.totalorder %s2265_s29, %s2261_s30 }
  0x3a   : > { %p2263_p8 = pnand %p2262_p7, %p2536_p5 }
  0x3b   : > { %p2268_p0 = por %p2267_p1, %p2266_p10 }
  0x3c   : > { %p2264_p9 = pneg %p2263_p8 }
  0x3e   : > { %p2269_p3 = pnand %p2268_p0, %p2264_p9 }
  0x40   : > { %2272 = shalt.err (!%p2269_p3)
}
  0x41   : > { %s2273_s18 = sshra.s32 %s274_s16, 4  ;;  %s2388_s14 = smov [#allocation2]   ;;  %s2274_s18 = int_to_ptr.vmem [resolvable:$true] %s2273_s18 }
  0x42   : > { %s2280_s19 = scalar_lea.vmem %s2274_s18, %s2256_s4  ;;  %s2284_s17 = scalar_lea.vmem %s2388_s14, 256 }
  0x43   : > { %p2281_p7 = scmp.ne.s32.totalorder %s2274_s18, %s2280_s19  ;;  %p2286_p4 = scmp.lt.s32.totalorder %s2284_s17, %s2280_s19 }
  0x45   : > { %p2282_p8 = pnand %p2281_p7, %p2536_p5 }
  0x47   : > { %p2283_p2 = pneg %p2282_p8 }
  0x49   : > { %p2288_p12 = pnand %p2286_p4, %p2283_p2 }
  0x4b   : > { %2291 = shalt.err (!%p2288_p12)
}
  0x4c   : > { %s2389_s1 = smov 128   ;;  %s2390_s30 = smov 8  }
  0x4d   : > { %279 = dma.hbm_to_vmem [thread:$0]  (%p2536_p5), %s2547_s26, %s1897_s28, %s274_s16, %s2533_s12, %s2389_s1, %s2389_s1, %s2390_s30  }
  0x4e PF: > { %285 = sbr.rel (%p2491_p13) target bundleno = 1170 (0x492), region = 44 }
  0x53   : > { %s2576_s4 = sand.u32 1, %s2370_s22  }
  0x54   : > { %s1899_s27 = sshll.u32 %s2576_s4, 7  ;;  %s288_s29 = scalar_lea.sflag [#allocation3], %s2576_s4 }
  0x55   : > { %s2582_s13 = scalar_lea.vmem [#allocation2], %s1899_s27 }
  0x56   : > { %2349 = dma.done.wait (%p2476_p6), %s288_s29, 2048  }
  0x57   : > { %2351 = vsyncadd (%p2476_p6), %s288_s29, 4294965248  ;;  %p3849_p4 = scmp.eq.s32.totalorder %s2452_s25, 0 }
  0x59   : > { %2353 = dma.done.wait (%p3849_p4), [#allocation6], 4128   ;;  %p3850_p12 = pmov %p3849_p4 }
  0x5a   : > { %p3851_p13 = pmov %p3849_p4 }
  0x5b   : > { %2355 = vsyncadd (%p3850_p12), [#allocation6], 4294963168 }
  0x5c   : > { %2357 = dma.done.wait (%p3851_p13), [#allocation9], 4128   ;;  %p3852_p2 = pmov %p3849_p4 }
  0x5d   : > { %v397_v0 = vld [vmem:[#allocation5 + $0xf0] sm:$0xff]  ;;  %v398_v1 = vld [vmem:[#allocation5 + $0xf8] sm:$0xff]  ;;  %v395_v2 = vld [vmem:[#allocation5 + $0xe0] sm:$0xff]  ;;  %v2391_v43 = vmov 0   ;;  %s3563_s20 = scalar_lea.vmem [#allocation11], %s1899_s27  ;;  %s1751_s12 = scalar_lea.sflag [#allocation4], %s2576_s4 }
  0x5e   : > { %2359 = vsyncadd (%p3852_p2), [#allocation9], 4294963168  ;;  %405 = vmatpush.msra.mxu0 %v397_v0  ;;  %470 = vmatpush.msra.mxu1 %v398_v1  ;;  %v396_v3 = vld [vmem:[#allocation5 + $0xe8] sm:$0xff]  ;;  %v393_v4 = vld [vmem:[#allocation5 + $0xd0] sm:$0xff]  ;;  %s1970_s7 = sshll.u32 (%p2483_p11), %s2452_s25, 4 }
  0x5f   : > { %v394_v5 = vld [vmem:[#allocation5 + $0xd8] sm:$0xff]  ;;  %v391_v6 = vld [vmem:[#allocation5 + $0xc0] sm:$0xff]  ;;  %v392_v7 = vld [vmem:[#allocation5 + $0xc8] sm:$0xff]  ;;  %s1759_s16 = ssub.s32 (%p2483_p11), 20, %s1970_s7 }
  0x60   : > { %406 = vmatpush.msra.mxu0 %v395_v2  ;;  %471 = vmatpush.msra.mxu1 %v396_v3  ;;  %v389_v8 = vld [vmem:[#allocation5 + $0xb0] sm:$0xff]  ;;  %v390_v9 = vld [vmem:[#allocation5 + $0xb8] sm:$0xff]  ;;  %v387_v10 = vld [vmem:[#allocation5 + $0xa0] sm:$0xff]  ;;  %p1760_p6 = scmp.lt.s32.totalorder (%p2483_p11), %s1759_s16, 16 }
  0x61   : > { %v388_v11 = vld [vmem:[#allocation5 + $0xa8] sm:$0xff]  ;;  %v385_v12 = vld [vmem:[#allocation5 + $0x90] sm:$0xff]  ;;  %v386_v13 = vld [vmem:[#allocation5 + $0x98] sm:$0xff] }
  0x62   : > { %407 = vmatpush.msra.mxu0 %v393_v4  ;;  %472 = vmatpush.msra.mxu1 %v394_v5  ;;  %v383_v14 = vld [vmem:[#allocation5 + $0x80] sm:$0xff]  ;;  %v384_v15 = vld [vmem:[#allocation5 + $0x88] sm:$0xff]  ;;  %v381_v16 = vld [vmem:[#allocation5 + $0x70] sm:$0xff] }
  0x63   : > { %v382_v17 = vld [vmem:[#allocation5 + $0x78] sm:$0xff]  ;;  %v379_v18 = vld [vmem:[#allocation5 + $0x60] sm:$0xff]  ;;  %v380_v19 = vld [vmem:[#allocation5 + $0x68] sm:$0xff] }
  0x64   : > { %408 = vmatpush.msra.mxu0 %v391_v6  ;;  %473 = vmatpush.msra.mxu1 %v392_v7  ;;  %v377_v20 = vld [vmem:[#allocation5 + $0x50] sm:$0xff]  ;;  %v378_v21 = vld [vmem:[#allocation5 + $0x58] sm:$0xff]  ;;  %v375_v22 = vld [vmem:[#allocation5 + $0x40] sm:$0xff] }
  0x65   : > { %v376_v23 = vld [vmem:[#allocation5 + $0x48] sm:$0xff]  ;;  %v373_v24 = vld [vmem:[#allocation5 + $0x30] sm:$0xff]  ;;  %v374_v25 = vld [vmem:[#allocation5 + $0x38] sm:$0xff] }
  0x66   : > { %409 = vmatpush.msra.mxu0 %v389_v8  ;;  %474 = vmatpush.msra.mxu1 %v390_v9  ;;  %v371_v26 = vld [vmem:[#allocation5 + $0x20] sm:$0xff]  ;;  %v372_v27 = vld [vmem:[#allocation5 + $0x28] sm:$0xff]  ;;  %v369_v28 = vld [vmem:[#allocation5 + $0x10] sm:$0xff] }
  0x67   : > { %v370_v29 = vld [vmem:[#allocation5 + $0x18] sm:$0xff]  ;;  %v367_v30 = vld [vmem:[#allocation5] sm:$0xff]  ;;  %v368_v31 = vld [vmem:[#allocation5 + $0x8] sm:$0xff] }
  0x68   : > { %410 = vmatpush.msra.mxu0 %v387_v10  ;;  %475 = vmatpush.msra.mxu1 %v388_v11  ;;  %v351_v32 = vld [vmem:[%s2582_s13] sm:$0xff]  ;;  %v352_v33 = vld [vmem:[%s2582_s13 + $0x8] sm:$0xff]  ;;  %v353_v34 = vld [vmem:[%s2582_s13 + $0x10] sm:$0xff] }
  0x69   : > { %v354_v35 = vld [vmem:[%s2582_s13 + $0x18] sm:$0xff]  ;;  %v355_v36 = vld [vmem:[%s2582_s13 + $0x20] sm:$0xff]  ;;  %v356_v37 = vld [vmem:[%s2582_s13 + $0x28] sm:$0xff] }
  0x6a   : > { %411 = vmatpush.msra.mxu0 %v385_v12  ;;  %476 = vmatpush.msra.mxu1 %v386_v13  ;;  %v357_v38 = vld [vmem:[%s2582_s13 + $0x30] sm:$0xff]  ;;  %v358_v39 = vld [vmem:[%s2582_s13 + $0x38] sm:$0xff]  ;;  %v359_v40 = vld [vmem:[%s2582_s13 + $0x40] sm:$0xff] }
  0x6b   : > { %v360_v41 = vld [vmem:[%s2582_s13 + $0x48] sm:$0xff]  ;;  %v536_v42 = vld [vmem:[#allocation8] sm:$0x3]  ;;  %v361_v45 = vld [vmem:[%s2582_s13 + $0x50] sm:$0xff] }
  0x6c   : > { %412 = vmatpush.msra.mxu0 %v383_v14  ;;  %477 = vmatpush.msra.mxu1 %v384_v15  ;;  %vm537_vm0 = vcmp.gt.f32.partialorder %v536_v42, 0.0  ;;  %v399_v46 = vld [vmem:[#allocation7] sm:$0x3]  ;;  %v362_v57 = vld [vmem:[%s2582_s13 + $0x58] sm:$0xff]  ;;  %v364_v9 = vld [vmem:[%s2582_s13 + $0x68] sm:$0xff] }
  0x6d   : > { %v538_v44 = vsel %vm537_vm0, 1, %v2391_v43  ;;  %v2607_v49 = vperm.slane %v399_v46, 0  ;;  %v2609_v50 = vperm.slane %v399_v46, 1  ;;  %v363_v1 = vld [vmem:[%s2582_s13 + $0x60] sm:$0xff]  ;;  %v365_v13 = vld [vmem:[%s2582_s13 + $0x70] sm:$0xff] }
  0x6e   : > { %413 = vmatpush.msra.mxu0 %v381_v16  ;;  %478 = vmatpush.msra.mxu1 %v382_v17  ;;  %v539_v47 = vperm.slane %v538_v44, 0  ;;  %v540_v48 = vperm.slane %v538_v44, 1 }
  0x70   : > { %414 = vmatpush.msra.mxu0 %v379_v18  ;;  %479 = vmatpush.msra.mxu1 %v380_v19  ;;  %vm2611_vm1 = vcmp.eq.s32.totalorder %v539_v47, 1  ;;  %vm2615_vm2 = vcmp.eq.s32.totalorder %v540_v48, 1  ;;  %v535_v47 = vld [vmem:[%s3763_s3] sm:$0x3] }
  0x71   : > { %v2753_v48 = vperm.slane %v535_v47, 0 }
  0x72   : > { %415 = vmatpush.msra.mxu0 %v377_v20  ;;  %480 = vmatpush.msra.mxu1 %v378_v21  ;;  %v366_v21 = vld [vmem:[%s2582_s13 + $0x78] sm:$0xff] }
  0x74   : > { %416 = vmatpush.msra.mxu0 %v375_v22  ;;  %481 = vmatpush.msra.mxu1 %v376_v23 }
  0x76   : > { %417 = vmatpush.msra.mxu0 %v373_v24  ;;  %482 = vmatpush.msra.mxu1 %v374_v25 }
  0x78   : > { %418 = vmatpush.msra.mxu0 %v371_v26  ;;  %483 = vmatpush.msra.mxu1 %v372_v27 }
  0x7a   : > { %419 = vmatpush.msra.mxu0 %v369_v28  ;;  %484 = vmatpush.msra.mxu1 %v370_v29 }
  0x7c   : > { %420 = vmatpush.msra.mxu0 %v367_v30  ;;  %485 = vmatpush.msra.mxu1 %v368_v31 }
  0x7d   : > { %421 = vmatmul.f32.vlgmr.msra.gmra.mxu0 %v351_v32  ;;  %486 = vmatmul.f32.vlgmr.msra.gmra.mxu1 %v351_v32 }
  0x85   : > { %424 = vmatmul.f32.gmra.mxu0 %v352_v33  ;;  %489 = vmatmul.f32.gmra.mxu1 %v352_v33 }
  0x8d   : > { %427 = vmatmul.f32.gmra.mxu0 %v353_v34  ;;  %492 = vmatmul.f32.gmra.mxu1 %v353_v34 }
  0x95   : > { %430 = vmatmul.f32.gmra.mxu0 %v354_v35  ;;  %495 = vmatmul.f32.gmra.mxu1 %v354_v35 }
  0x9d   : > { %433 = vmatmul.f32.gmra.mxu0 %v355_v36  ;;  %498 = vmatmul.f32.gmra.mxu1 %v355_v36 }
  0xa5   : > { %436 = vmatmul.f32.gmra.mxu0 %v356_v37  ;;  %501 = vmatmul.f32.gmra.mxu1 %v356_v37 }
  0xad   : > { %439 = vmatmul.f32.gmra.mxu0 %v357_v38  ;;  %504 = vmatmul.f32.gmra.mxu1 %v357_v38 }
  0xb5   : > { %442 = vmatmul.f32.gmra.mxu0 %v358_v39  ;;  %507 = vmatmul.f32.gmra.mxu1 %v358_v39 }
  0xbd   : > { %445 = vmatmul.f32.gmra.mxu0 %v359_v40  ;;  %510 = vmatmul.f32.gmra.mxu1 %v359_v40 }
  0xc5   : > { %448 = vmatmul.f32.gmra.mxu0 %v360_v41  ;;  %513 = vmatmul.f32.gmra.mxu1 %v360_v41 }
  0xcd   : > { %451 = vmatmul.f32.gmra.mxu0 %v361_v45  ;;  %516 = vmatmul.f32.gmra.mxu1 %v361_v45 }
  0xd5   : > { %454 = vmatmul.f32.gmra.mxu0 %v362_v57  ;;  %519 = vmatmul.f32.gmra.mxu1 %v362_v57 }
  0xdd   : > { %457 = vmatmul.f32.gmra.mxu0 %v363_v1  ;;  %522 = vmatmul.f32.gmra.mxu1 %v363_v1 }
  0xe5   : > { %460 = vmatmul.f32.gmra.mxu0 %v364_v9  ;;  %525 = vmatmul.f32.gmra.mxu1 %v364_v9 }
  0xed   : > { %463 = vmatmul.f32.gmra.mxu0 %v365_v13  ;;  %528 = vmatmul.f32.gmra.mxu1 %v365_v13 }
  0xf5   : > { %466 = vmatmul.f32.gmra.mxu0 %v366_v21  ;;  %531 = vmatmul.f32.gmra.mxu1 %v366_v21 }
  0xfa   : > { %v422_v51 = vpop.f32.mrf.mxu0  ;;  %v487_v52 = vpop.f32.mrf.mxu1 }
  0xfb   : > { %v2620_v55 = vadd.f32 %v422_v51, %v2607_v49  ;;  %v2623_v56 = vadd.f32 %v487_v52, %v2609_v50  ;;  %v2755_v51 = vperm.slane %v535_v47, 1 }
  0xfd   : > { %v2629_v58 = vsel %vm2611_vm1, %v2620_v55, -1e+30  ;;  %v2634_v59 = vsel %vm2615_vm2, %v2623_v56, -1e+30 }
  0xfe   : > { %v575_v60 = vmax.f32 %v2629_v58, %v2634_v59 }
 0x100   : > { %576 = vmax.xlane.f32.xlu0 %v575_v60 }
 0x102   : > { %v425_v61 = vpop.f32.mrf.mxu0  ;;  %v490_v62 = vpop.f32.mrf.mxu1 }
 0x103   : > { %v2639_v63 = vadd.f32 %v425_v61, %v2607_v49  ;;  %v2642_v0 = vadd.f32 %v490_v62, %v2609_v50 }
 0x105   : > { %v2648_v2 = vsel %vm2611_vm1, %v2639_v63, -1e+30  ;;  %v2653_v3 = vsel %vm2615_vm2, %v2642_v0, -1e+30 }
 0x106   : > { %v578_v4 = vmax.f32 %v2648_v2, %v2653_v3 }
 0x108   : > { %579 = vmax.xlane.f32.xlu0 %v578_v4 }
 0x10a   : > { %v428_v5 = vpop.f32.mrf.mxu0  ;;  %v493_v6 = vpop.f32.mrf.mxu1 }
 0x10b   : > { %v2658_v7 = vadd.f32 %v428_v5, %v2607_v49  ;;  %v2661_v8 = vadd.f32 %v493_v6, %v2609_v50 }
 0x10d   : > { %v2667_v10 = vsel %vm2611_vm1, %v2658_v7, -1e+30  ;;  %v2672_v11 = vsel %vm2615_vm2, %v2661_v8, -1e+30 }
 0x10e   : > { %v581_v12 = vmax.f32 %v2667_v10, %v2672_v11 }
 0x110   : > { %582 = vmax.xlane.f32.xlu1 %v581_v12 }
 0x112   : > { %v431_v14 = vpop.f32.mrf.mxu0  ;;  %v496_v15 = vpop.f32.mrf.mxu1 }
 0x113   : > { %v2678_v16 = vadd.f32 %v431_v14, %v2607_v49  ;;  %v2681_v17 = vadd.f32 %v496_v15, %v2609_v50 }
 0x115   : > { %v2686_v18 = vsel %vm2611_vm1, %v2678_v16, -1e+30  ;;  %v2691_v19 = vsel %vm2615_vm2, %v2681_v17, -1e+30 }
 0x116   : > { %v584_v20 = vmax.f32 %v2686_v18, %v2691_v19 }
 0x118   : > { %585 = vmax.xlane.f32.xlu1 %v584_v20 }
 0x11a   : > { %v434_v22 = vpop.f32.mrf.mxu0  ;;  %v499_v23 = vpop.f32.mrf.mxu1 }
 0x11b   : > { %v2697_v24 = vadd.f32 %v434_v22, %v2607_v49  ;;  %v2700_v25 = vadd.f32 %v499_v23, %v2609_v50 }
 0x11d   : > { %v2705_v26 = vsel %vm2611_vm1, %v2697_v24, -1e+30  ;;  %v2710_v27 = vsel %vm2615_vm2, %v2700_v25, -1e+30 }
 0x11e   : > { %v587_v28 = vmax.f32 %v2705_v26, %v2710_v27 }
 0x120   : > { %588 = vmax.xlane.f32.xlu2 %v587_v28 }
 0x122   : > { %v437_v29 = vpop.f32.mrf.mxu0  ;;  %v502_v30 = vpop.f32.mrf.mxu1 }
 0x123   : > { %v2715_v31 = vadd.f32 %v437_v29, %v2607_v49  ;;  %v2718_v32 = vadd.f32 %v502_v30, %v2609_v50 }
 0x125   : > { %v2723_v33 = vsel %vm2611_vm1, %v2715_v31, -1e+30  ;;  %v2728_v34 = vsel %vm2615_vm2, %v2718_v32, -1e+30 }
 0x126   : > { %v590_v35 = vmax.f32 %v2723_v33, %v2728_v34 }
 0x128   : > { %591 = vmax.xlane.f32.xlu2 %v590_v35 }
 0x12a   : > { %v440_v36 = vpop.f32.mrf.mxu0  ;;  %v505_v37 = vpop.f32.mrf.mxu1 }
 0x12b   : > { %v2733_v38 = vadd.f32 %v440_v36, %v2607_v49  ;;  %v2736_v39 = vadd.f32 %v505_v37, %v2609_v50 }
 0x12d   : > { %3857 = vst [vmem:[#allocation18_spill] sm:$0xff] %v2736_v39  ;;  %v2741_v40 = vsel %vm2611_vm1, %v2733_v38, -1e+30  ;;  %v2746_v41 = vsel %vm2615_vm2, %v2736_v39, -1e+30 }
 0x12e   : > { %v593_v42 = vmax.f32 %v2741_v40, %v2746_v41 }
 0x130   : > { %594 = vmax.xlane.f32.xlu1 %v593_v42 }
 0x132   : > { %v443_v43 = vpop.f32.mrf.mxu0  ;;  %v508_v44 = vpop.f32.mrf.mxu1 }
 0x133   : > { %v2762_v4 = vadd.f32 %v443_v43, %v2607_v49  ;;  %v2765_v5 = vadd.f32 %v508_v44, %v2609_v50 }
 0x135   : > { %3858 = vst [vmem:[#allocation19_spill] sm:$0xff] %v2762_v4  ;;  %v2770_v6 = vsel %vm2611_vm1, %v2762_v4, -1e+30  ;;  %v2775_v9 = vsel %vm2615_vm2, %v2765_v5, -1e+30 }
 0x136   : > { %3859 = vst [vmem:[#allocation20_spill] sm:$0xff] %v2765_v5  ;;  %v596_v13 = vmax.f32 %v2770_v6, %v2775_v9 }
 0x13a   : > { %v446_v45 = vpop.f32.mrf.mxu0  ;;  %v511_v46 = vpop.f32.mrf.mxu1 }
 0x13b   : > { %v2784_v21 = vadd.f32 %v446_v45, %v2607_v49  ;;  %v2787_v22 = vadd.f32 %v511_v46, %v2609_v50 }
 0x13d   : > { %3860 = vst [vmem:[#allocation21_spill] sm:$0xff] %v2784_v21  ;;  %v2792_v29 = vsel %vm2611_vm1, %v2784_v21, -1e+30  ;;  %v2797_v30 = vsel %vm2615_vm2, %v2787_v22, -1e+30 }
 0x13e   : > { %3861 = vst [vmem:[#allocation22_spill] sm:$0xff] %v2787_v22  ;;  %v599_v36 = vmax.f32 %v2792_v29, %v2797_v30 }
 0x142   : > { %v449_v62 = vpop.f32.mrf.mxu0  ;;  %v514_v1 = vpop.f32.mrf.mxu1 }
 0x143   : > { %v2806_v43 = vadd.f32 %v449_v62, %v2607_v49  ;;  %v2809_v44 = vadd.f32 %v514_v1, %v2609_v50 }
 0x145   : > { %3862 = vst [vmem:[#allocation23_spill] sm:$0xff] %v2806_v43  ;;  %v2814_v46 = vsel %vm2611_vm1, %v2806_v43, -1e+30  ;;  %v2819_v47 = vsel %vm2615_vm2, %v2809_v44, -1e+30 }
 0x146   : > { %3863 = vst [vmem:[#allocation24_spill] sm:$0xff] %v2809_v44 }
 0x14a   : > { %v452_v23 = vpop.f32.mrf.mxu0  ;;  %v517_v28 = vpop.f32.mrf.mxu1 }
 0x173   : > { %v577_v52 = vpop.xlane.xlu0 %576 }
 0x174   : > { %vm623_vm3 = vcmp.eq.f32.partialorder %v2629_v58, %v577_v52  ;;  %vm624_vm4 = vcmp.eq.f32.partialorder %v2634_v59, %v577_v52  ;;  %v455_v52 = vpop.f32.mrf.mxu0 }
 0x175   : > { %v660_v57 = vsel %vm623_vm3, %v2753_v48, 4.0  ;;  %v661_v60 = vsel %vm624_vm4, %v2755_v51, 4.0 }
 0x176   : > { %v692_v61 = vmin.f32 %v660_v57, %v661_v60  ;;  %v520_v57 = vpop.f32.mrf.mxu1 }
 0x178   : > { %693 = vmin.xlane.f32.xlu0 %v692_v61  ;;  %v602_v61 = vmax.f32 %v2814_v46, %v2819_v47 }
 0x17b   : > { %v580_v12 = vpop.xlane.xlu0 %579 }
 0x17c   : > { %vm625_vm5 = vcmp.eq.f32.partialorder %v2648_v2, %v580_v12  ;;  %vm626_vm6 = vcmp.eq.f32.partialorder %v2653_v3, %v580_v12  ;;  %v2828_v12 = vadd.f32 %v452_v23, %v2607_v49 }
 0x17d   : > { %v662_v14 = vsel %vm625_vm5, %v2753_v48, 4.0  ;;  %v663_v15 = vsel %vm626_vm6, %v2755_v51, 4.0 }
 0x17e   : > { %v695_v20 = vmin.f32 %v662_v14, %v663_v15  ;;  %3864 = vst [vmem:[#allocation25_spill] sm:$0xff] %v2828_v12  ;;  %v2836_v15 = vsel %vm2611_vm1, %v2828_v12, -1e+30 }
 0x180   : > { %597 = vmax.xlane.f32.xlu0 %v596_v13  ;;  %696 = vmin.xlane.f32.xlu2 %v695_v20  ;;  %v2831_v13 = vadd.f32 %v517_v28, %v2609_v50  ;;  %v458_v28 = vpop.f32.mrf.mxu0 }
 0x182   : > { %3865 = vst [vmem:[#allocation26_spill] sm:$0xff] %v2831_v13  ;;  %v2841_v20 = vsel %vm2615_vm2, %v2831_v13, -1e+30 }
 0x183   : > { %v583_v35 = vpop.xlane.xlu1 %582  ;;  %v605_v23 = vmax.f32 %v2836_v15, %v2841_v20 }
 0x184   : > { %vm627_vm7 = vcmp.eq.f32.partialorder %v2667_v10, %v583_v35  ;;  %vm628_vm8 = vcmp.eq.f32.partialorder %v2672_v11, %v583_v35 }
 0x185   : > { %v664_v37 = vsel %vm627_vm7, %v2753_v48, 4.0  ;;  %v665_v42 = vsel %vm628_vm8, %v2755_v51, 4.0 }
 0x186   : > { %v698_v45 = vmin.f32 %v664_v37, %v665_v42 }
 0x188   : > { %699 = vmin.xlane.f32.xlu1 %v698_v45  ;;  %600 = vmax.xlane.f32.xlu2 %v599_v36  ;;  %v523_v36 = vpop.f32.mrf.mxu1  ;;  %v2850_v45 = vadd.f32 %v455_v52, %v2607_v49 }
 0x18a   : > { %3866 = vst [vmem:[#allocation27_spill] sm:$0xff] %v2850_v45 }
 0x18b   : > { %v586_v60 = vpop.xlane.xlu1 %585 }
 0x18c   : > { %vm629_vm9 = vcmp.eq.f32.partialorder %v2686_v18, %v586_v60  ;;  %vm630_vm10 = vcmp.eq.f32.partialorder %v2691_v19, %v586_v60  ;;  %v2853_v60 = vadd.f32 %v520_v57, %v2609_v50 }
 0x18d   : > { %v666_v62 = vsel %vm629_vm9, %v2753_v48, 4.0  ;;  %v667_v1 = vsel %vm630_vm10, %v2755_v51, 4.0 }
 0x18e   : > { %v701_v14 = vmin.f32 %v666_v62, %v667_v1  ;;  %3867 = vst [vmem:[#allocation28_spill] sm:$0xff] %v2853_v60  ;;  %v2858_v62 = vsel %vm2611_vm1, %v2850_v45, -1e+30  ;;  %v2863_v1 = vsel %vm2615_vm2, %v2853_v60, -1e+30 }
 0x18f   : > { %v608_v52 = vmax.f32 %v2858_v62, %v2863_v1 }
 0x190   : > { %603 = vmax.xlane.f32.xlu1 %v602_v61  ;;  %702 = vmin.xlane.f32.xlu0 %v701_v14  ;;  %v526_v60 = vpop.f32.mrf.mxu1 }
 0x193   : > { %v589_v35 = vpop.xlane.xlu2 %588 }
 0x194   : > { %vm631_vm11 = vcmp.eq.f32.partialorder %v2705_v26, %v589_v35  ;;  %vm632_vm12 = vcmp.eq.f32.partialorder %v2710_v27, %v589_v35 }
 0x195   : > { %v668_v37 = vsel %vm631_vm11, %v2753_v48, 4.0  ;;  %v669_v42 = vsel %vm632_vm12, %v2755_v51, 4.0 }
 0x196   : > { %v704_v61 = vmin.f32 %v668_v37, %v669_v42  ;;  %v2875_v37 = vadd.f32 %v523_v36, %v2609_v50 }
 0x198   : > { %606 = vmax.xlane.f32.xlu0 %v605_v23  ;;  %705 = vmin.xlane.f32.xlu2 %v704_v61  ;;  %v2872_v23 = vadd.f32 %v458_v28, %v2607_v49  ;;  %3869 = vst [vmem:[#allocation30_spill] sm:$0xff] %v2875_v37  ;;  %v461_v61 = vpop.f32.mrf.mxu0  ;;  %v2885_v45 = vsel %vm2615_vm2, %v2875_v37, -1e+30  ;;  %v529_v13 = vpop.f32.mrf.mxu1 }
 0x19a   : > { %3868 = vst [vmem:[#allocation29_spill] sm:$0xff] %v2872_v23 }
 0x19b   : > { %v592_v14 = vpop.xlane.xlu2 %591 }
 0x19c   : > { %vm633_vm13 = vcmp.eq.f32.partialorder %v2723_v33, %v592_v14  ;;  %vm634_vm14 = vcmp.eq.f32.partialorder %v2728_v34, %v592_v14  ;;  %v2880_v14 = vsel %vm2611_vm1, %v2872_v23, -1e+30 }
 0x19d   : > { %v670_v57 = vsel %vm633_vm13, %v2753_v48, 4.0  ;;  %v671_v35 = vsel %vm634_vm14, %v2755_v51, 4.0  ;;  %v611_v36 = vmax.f32 %v2880_v14, %v2885_v45 }
 0x19e   : > { %v707_v42 = vmin.f32 %v670_v57, %v671_v35  ;;  %v2894_v35 = vadd.f32 %v461_v61, %v2607_v49 }
 0x1a0   : > { %708 = vmin.xlane.f32.xlu1 %v707_v42  ;;  %609 = vmax.xlane.f32.xlu2 %v608_v52  ;;  %3870 = vst [vmem:[#allocation31_spill] sm:$0xff] %v2894_v35  ;;  %v2897_v42 = vadd.f32 %v526_v60, %v2609_v50  ;;  %v464_v23 = vpop.f32.mrf.mxu0 }
 0x1a1   : > { %v2912_v60 = vadd.f32 %v464_v23, %v2607_v49 }
 0x1a2   : > { %3871 = vst [vmem:[#allocation32_spill] sm:$0xff] %v2897_v42  ;;  %v2907_v12 = vsel %vm2615_vm2, %v2897_v42, -1e+30  ;;  %v532_v42 = vpop.f32.mrf.mxu1 }
 0x1a3   : > { %v595_v28 = vpop.xlane.xlu1 %594  ;;  %3872 = vst [vmem:[#allocation33_spill] sm:$0xff] %v2912_v60 }
 0x1a4   : > { %vm635_vm15 = vcmp.eq.f32.partialorder %v2741_v40, %v595_v28  ;;  %vm636_vm0 = vcmp.eq.f32.partialorder %v2746_v41, %v595_v28  ;;  %v2902_v28 = vsel %vm2611_vm1, %v2894_v35, -1e+30 }
 0x1a5   : > { %v672_v52 = vsel %vm635_vm15, %v2753_v48, 4.0  ;;  %v673_v57 = vsel %vm636_vm0, %v2755_v51, 4.0  ;;  %v614_v61 = vmax.f32 %v2902_v28, %v2907_v12 }
 0x1a6   : > { %v710_v37 = vmin.f32 %v672_v52, %v673_v57 }
 0x1a8   : > { %711 = vmin.xlane.f32.xlu1 %v710_v37  ;;  %612 = vmax.xlane.f32.xlu2 %v611_v36  ;;  %v2915_v37 = vadd.f32 %v529_v13, %v2609_v50  ;;  %v2920_v36 = vsel %vm2611_vm1, %v2912_v60, -1e+30  ;;  %v467_v57 = vpop.f32.mrf.mxu0  ;;  %v2933_v13 = vadd.f32 %v532_v42, %v2609_v50  ;;  %v3799_v50 = vmov 0.0  }
 0x1a9   : > { %v2930_v35 = vadd.f32 %v467_v57, %v2607_v49 }
 0x1aa   : > { %3873 = vst [vmem:[#allocation34_spill] sm:$0xff] %v2915_v37  ;;  %v2925_v52 = vsel %vm2615_vm2, %v2915_v37, -1e+30  ;;  %v2943_v37 = vsel %vm2615_vm2, %v2933_v13, -1e+30 }
 0x1ab   : > { %v617_v23 = vmax.f32 %v2920_v36, %v2925_v52  ;;  %3874 = vst [vmem:[#allocation35_spill] sm:$0xff] %v2930_v35 }
 0x1ac   : > { %3875 = vst [vmem:[#allocation36_spill] sm:$0xff] %v2933_v13 }
 0x1b0   : > { %615 = vmax.xlane.f32.xlu2 %v614_v61  ;;  %v2938_v61 = vsel %vm2611_vm1, %v2930_v35, -1e+30 }
 0x1b1   : > { %v620_v60 = vmax.f32 %v2938_v61, %v2943_v37 }
 0x1b8   : > { %618 = vmax.xlane.f32.xlu2 %v617_v23 }
 0x1c0   : > { %621 = vmax.xlane.f32.xlu2 %v620_v60 }
 0x1eb   : > { %v694_v49 = vpop.xlane.xlu0 %693 }
 0x1ec   : > { %vm740_vm3 = vcmp.eq.f32.partialorder %v2753_v48, %v694_v49  ;;  %vm741_vm4 = vcmp.eq.f32.partialorder %v2755_v51, %v694_v49 }
 0x1ed   : > { %v2950_v42 = vsel %vm740_vm3, 1.0, %v3799_v50  ;;  %v2953_v57 = vsel %vm741_vm4, 1.0, %v3799_v50 }
 0x1ee   : > { %vm868_vm5 = vcmp.gt.f32.partialorder %v2950_v42, 0.0  ;;  %vm869_vm6 = vcmp.gt.f32.partialorder %v2953_v57, 0.0 }
 0x1ef   : > { %v2958_v23 = vsel %vm868_vm5, -1e+30, %v2629_v58  ;;  %v2961_v60 = vsel %vm869_vm6, -1e+30, %v2634_v59 }
 0x1f0   : > { %v932_v49 = vmax.f32 %v2958_v23, %v2961_v60 }
 0x1f2   : > { %933 = vmax.xlane.f32.xlu0 %v932_v49 }
 0x1f3   : > { %v697_v13 = vpop.xlane.xlu2 %696  ;;  %v598_v35 = vpop.xlane.xlu0 %597 }
 0x1f4   : > { %vm742_vm7 = vcmp.eq.f32.partialorder %v2753_v48, %v697_v13  ;;  %vm743_vm8 = vcmp.eq.f32.partialorder %v2755_v51, %v697_v13  ;;  %vm637_vm9 = vcmp.eq.f32.partialorder %v2770_v6, %v598_v35  ;;  %vm638_vm10 = vcmp.eq.f32.partialorder %v2775_v9, %v598_v35 }
 0x1f5   : > { %v2970_v58 = vsel %vm742_vm7, 1.0, %v3799_v50  ;;  %v2973_v59 = vsel %vm743_vm8, 1.0, %v3799_v50  ;;  %v674_v44 = vsel %vm637_vm9, %v2753_v48, 4.0  ;;  %v675_v49 = vsel %vm638_vm10, %v2755_v51, 4.0 }
 0x1f6   : > { %v713_v43 = vmin.f32 %v674_v44, %v675_v49  ;;  %vm870_vm11 = vcmp.gt.f32.partialorder %v2970_v58, 0.0  ;;  %vm871_vm12 = vcmp.gt.f32.partialorder %v2973_v59, 0.0 }
 0x1f7   : > { %v2980_v13 = vsel %vm870_vm11, -1e+30, %v2648_v2  ;;  %v2983_v35 = vsel %vm871_vm12, -1e+30, %v2653_v3  ;;  %v3876_v2 = vmov 0.0  }
 0x1f8   : > { %714 = vmin.xlane.f32.xlu1 %v713_v43  ;;  %v935_v50 = vmax.f32 %v2980_v13, %v2983_v35 }
 0x1fa   : > { %936 = vmax.xlane.f32.xlu0 %v935_v50 }
 0x1fb   : > { %v700_v22 = vpop.xlane.xlu1 %699  ;;  %v601_v21 = vpop.xlane.xlu2 %600 }
 0x1fc   : > { %vm744_vm13 = vcmp.eq.f32.partialorder %v2753_v48, %v700_v22  ;;  %vm745_vm14 = vcmp.eq.f32.partialorder %v2755_v51, %v700_v22  ;;  %vm639_vm15 = vcmp.eq.f32.partialorder %v2792_v29, %v601_v21  ;;  %vm640_vm0 = vcmp.eq.f32.partialorder %v2797_v30, %v601_v21 }
 0x1fd   : > { %v2992_v44 = vsel %vm744_vm13, 1.0, %v3876_v2  ;;  %v2995_v3 = vsel %vm745_vm14, 1.0, %v3876_v2  ;;  %v676_v43 = vsel %vm639_vm15, %v2753_v48, 4.0  ;;  %v677_v50 = vsel %vm640_vm0, %v2755_v51, 4.0 }
 0x1fe   : > { %3877 = vst [vmem:[#allocation37_spill] sm:$0xff] %v2992_v44  ;;  %v716_v49 = vmin.f32 %v676_v43, %v677_v50  ;;  %vm872_vm3 = vcmp.gt.f32.partialorder %v2992_v44, 0.0  ;;  %vm873_vm4 = vcmp.gt.f32.partialorder %v2995_v3, 0.0 }
 0x1ff   : > { %3878 = vst [vmem:[#allocation38_spill] sm:$0xff] %v2995_v3  ;;  %v3002_v22 = vsel %vm872_vm3, -1e+30, %v2667_v10  ;;  %v3005_v21 = vsel %vm873_vm4, -1e+30, %v2672_v11 }
 0x200   : > { %717 = vmin.xlane.f32.xlu1 %v716_v49  ;;  %v938_v5 = vmax.f32 %v3002_v22, %v3005_v21 }
 0x202   : > { %939 = vmax.xlane.f32.xlu0 %v938_v5 }
 0x203   : > { %v604_v4 = vpop.xlane.xlu1 %603  ;;  %v703_v39 = vpop.xlane.xlu0 %702 }
 0x204   : > { %vm641_vm5 = vcmp.eq.f32.partialorder %v2814_v46, %v604_v4  ;;  %vm642_vm6 = vcmp.eq.f32.partialorder %v2819_v47, %v604_v4  ;;  %vm746_vm7 = vcmp.eq.f32.partialorder %v2753_v48, %v703_v39  ;;  %vm747_vm8 = vcmp.eq.f32.partialorder %v2755_v51, %v703_v39 }
 0x205   : > { %v3014_v10 = vsel %vm746_vm7, 1.0, %v3876_v2  ;;  %v3017_v11 = vsel %vm747_vm8, 1.0, %v3876_v2  ;;  %v678_v43 = vsel %vm641_vm5, %v2753_v48, 4.0  ;;  %v679_v5 = vsel %vm642_vm6, %v2755_v51, 4.0 }
 0x206   : > { %3879 = vst [vmem:[#allocation39_spill] sm:$0xff] %v3014_v10  ;;  %v719_v50 = vmin.f32 %v678_v43, %v679_v5  ;;  %vm874_vm9 = vcmp.gt.f32.partialorder %v3014_v10, 0.0  ;;  %vm875_vm10 = vcmp.gt.f32.partialorder %v3017_v11, 0.0 }
 0x207   : > { %3880 = vst [vmem:[#allocation40_spill] sm:$0xff] %v3017_v11  ;;  %v3024_v4 = vsel %vm874_vm9, -1e+30, %v2686_v18  ;;  %v3027_v39 = vsel %vm875_vm10, -1e+30, %v2691_v19 }
 0x208   : > { %720 = vmin.xlane.f32.xlu1 %v719_v50  ;;  %v941_v49 = vmax.f32 %v3024_v4, %v3027_v39 }
 0x20a   : > { %942 = vmax.xlane.f32.xlu0 %v941_v49 }
 0x20b   : > { %v706_v3 = vpop.xlane.xlu2 %705  ;;  %v607_v44 = vpop.xlane.xlu0 %606 }
 0x20c   : > { %vm748_vm11 = vcmp.eq.f32.partialorder %v2753_v48, %v706_v3  ;;  %vm749_vm12 = vcmp.eq.f32.partialorder %v2755_v51, %v706_v3  ;;  %vm643_vm13 = vcmp.eq.f32.partialorder %v2836_v15, %v607_v44  ;;  %vm644_vm14 = vcmp.eq.f32.partialorder %v2841_v20, %v607_v44 }
 0x20d   : > { %v3036_v18 = vsel %vm748_vm11, 1.0, %v3876_v2  ;;  %v3039_v19 = vsel %vm749_vm12, 1.0, %v3876_v2  ;;  %v680_v43 = vsel %vm643_vm13, %v2753_v48, 4.0  ;;  %v681_v5 = vsel %vm644_vm14, %v2755_v51, 4.0 }
 0x20e   : > { %3881 = vst [vmem:[#allocation41_spill] sm:$0xff] %v3036_v18  ;;  %v722_v50 = vmin.f32 %v680_v43, %v681_v5  ;;  %vm876_vm15 = vcmp.gt.f32.partialorder %v3036_v18, 0.0  ;;  %vm877_vm0 = vcmp.gt.f32.partialorder %v3039_v19, 0.0 }
 0x20f   : > { %3882 = vst [vmem:[#allocation42_spill] sm:$0xff] %v3039_v19  ;;  %v3046_v3 = vsel %vm876_vm15, -1e+30, %v2705_v26  ;;  %v3049_v44 = vsel %vm877_vm0, -1e+30, %v2710_v27 }
 0x210   : > { %723 = vmin.xlane.f32.xlu1 %v722_v50  ;;  %v944_v49 = vmax.f32 %v3046_v3, %v3049_v44 }
 0x212   : > { %945 = vmax.xlane.f32.xlu0 %v944_v49 }
 0x213   : > { %v709_v11 = vpop.xlane.xlu1 %708  ;;  %v610_v10 = vpop.xlane.xlu2 %609 }
 0x214   : > { %vm750_vm3 = vcmp.eq.f32.partialorder %v2753_v48, %v709_v11  ;;  %vm751_vm4 = vcmp.eq.f32.partialorder %v2755_v51, %v709_v11  ;;  %vm645_vm5 = vcmp.eq.f32.partialorder %v2858_v62, %v610_v10  ;;  %vm646_vm6 = vcmp.eq.f32.partialorder %v2863_v1, %v610_v10 }
 0x215   : > { %v3058_v26 = vsel %vm750_vm3, 1.0, %v3876_v2  ;;  %v3061_v27 = vsel %vm751_vm4, 1.0, %v3876_v2  ;;  %v682_v43 = vsel %vm645_vm5, %v2753_v48, 4.0  ;;  %v683_v5 = vsel %vm646_vm6, %v2755_v51, 4.0 }
 0x216   : > { %3883 = vst [vmem:[#allocation43_spill] sm:$0xff] %v3058_v26  ;;  %vm878_vm7 = vcmp.gt.f32.partialorder %v3058_v26, 0.0  ;;  %vm879_vm8 = vcmp.gt.f32.partialorder %v3061_v27, 0.0  ;;  %v725_v49 = vmin.f32 %v682_v43, %v683_v5 }
 0x217   : > { %3884 = vst [vmem:[#allocation44_spill] sm:$0xff] %v3061_v27  ;;  %v3068_v11 = vsel %vm878_vm7, -1e+30, %v2723_v33  ;;  %v3071_v50 = vsel %vm879_vm8, -1e+30, %v2728_v34 }
 0x218   : > { %v947_v10 = vmax.f32 %v3068_v11, %v3071_v50 }
 0x21a   : > { %948 = vmax.xlane.f32.xlu2 %v947_v10  ;;  %726 = vmin.xlane.f32.xlu0 %v725_v49 }
 0x21b   : > { %v712_v19 = vpop.xlane.xlu1 %711  ;;  %v613_v18 = vpop.xlane.xlu2 %612 }
 0x21c   : > { %vm752_vm9 = vcmp.eq.f32.partialorder %v2753_v48, %v712_v19  ;;  %vm753_vm10 = vcmp.eq.f32.partialorder %v2755_v51, %v712_v19  ;;  %vm647_vm11 = vcmp.eq.f32.partialorder %v2880_v14, %v613_v18  ;;  %vm648_vm12 = vcmp.eq.f32.partialorder %v2885_v45, %v613_v18 }
 0x21d   : > { %v3080_v33 = vsel %vm752_vm9, 1.0, %v3876_v2  ;;  %v3083_v34 = vsel %vm753_vm10, 1.0, %v3876_v2  ;;  %v684_v43 = vsel %vm647_vm11, %v2753_v48, 4.0  ;;  %v685_v5 = vsel %vm648_vm12, %v2755_v51, 4.0 }
 0x21e   : > { %3885 = vst [vmem:[#allocation45_spill] sm:$0xff] %v3080_v33  ;;  %vm880_vm13 = vcmp.gt.f32.partialorder %v3080_v33, 0.0  ;;  %vm881_vm14 = vcmp.gt.f32.partialorder %v3083_v34, 0.0  ;;  %v728_v49 = vmin.f32 %v684_v43, %v685_v5 }
 0x21f   : > { %3886 = vst [vmem:[#allocation46_spill] sm:$0xff] %v3083_v34  ;;  %v3090_v19 = vsel %vm880_vm13, -1e+30, %v2741_v40  ;;  %v3093_v10 = vsel %vm881_vm14, -1e+30, %v2746_v41 }
 0x220   : > { %v950_v18 = vmax.f32 %v3090_v19, %v3093_v10 }
 0x222   : > { %951 = vmax.xlane.f32.xlu2 %v950_v18  ;;  %729 = vmin.xlane.f32.xlu0 %v728_v49 }
 0x223   : > { %v616_v27 = vpop.xlane.xlu2 %615 }
 0x224   : > { %vm649_vm15 = vcmp.eq.f32.partialorder %v2902_v28, %v616_v27  ;;  %vm650_vm0 = vcmp.eq.f32.partialorder %v2907_v12, %v616_v27 }
 0x225   : > { %v686_v33 = vsel %vm649_vm15, %v2753_v48, 4.0  ;;  %v687_v34 = vsel %vm650_vm0, %v2755_v51, 4.0 }
 0x226   : > { %v731_v40 = vmin.f32 %v686_v33, %v687_v34 }
 0x22a   : > { %732 = vmin.xlane.f32.xlu0 %v731_v40 }
 0x22b   : > { %v619_v26 = vpop.xlane.xlu2 %618 }
 0x22c   : > { %vm651_vm3 = vcmp.eq.f32.partialorder %v2920_v36, %v619_v26  ;;  %vm652_vm4 = vcmp.eq.f32.partialorder %v2925_v52, %v619_v26 }
 0x22d   : > { %v688_v41 = vsel %vm651_vm3, %v2753_v48, 4.0  ;;  %v689_v43 = vsel %vm652_vm4, %v2755_v51, 4.0 }
 0x22e   : > { %v734_v5 = vmin.f32 %v688_v41, %v689_v43 }
 0x232   : > { %735 = vmin.xlane.f32.xlu0 %v734_v5 }
 0x233   : > { %v622_v18 = vpop.xlane.xlu2 %621 }
 0x234   : > { %vm653_vm5 = vcmp.eq.f32.partialorder %v2938_v61, %v622_v18  ;;  %vm654_vm6 = vcmp.eq.f32.partialorder %v2943_v37, %v622_v18 }
 0x235   : > { %v690_v27 = vsel %vm653_vm5, %v2753_v48, 4.0  ;;  %v691_v33 = vsel %vm654_vm6, %v2755_v51, 4.0 }
 0x236   : > { %v737_v34 = vmin.f32 %v690_v27, %v691_v33 }
 0x23a   : > { %738 = vmin.xlane.f32.xlu0 %v737_v34 }
 0x265   : > { %v934_v49 = vpop.xlane.xlu0 %933 }
 0x266   : > { %vm980_vm7 = vcmp.eq.f32.partialorder %v2958_v23, %v934_v49  ;;  %vm981_vm8 = vcmp.eq.f32.partialorder %v2961_v60, %v934_v49 }
 0x267   : > { %v1012_v26 = vsel %vm980_vm7, %v2753_v48, 4.0  ;;  %v1013_v40 = vsel %vm981_vm8, %v2755_v51, 4.0 }
 0x268   : > { %v1044_v41 = vmin.f32 %v1012_v26, %v1013_v40 }
 0x26a   : > { %1045 = vmin.xlane.f32.xlu1 %v1044_v41 }
 0x26b   : > { %v715_v43 = vpop.xlane.xlu1 %714 }
 0x26c   : > { %vm754_vm9 = vcmp.eq.f32.partialorder %v2753_v48, %v715_v43  ;;  %vm755_vm10 = vcmp.eq.f32.partialorder %v2755_v51, %v715_v43 }
 0x26d   : > { %v3116_v5 = vsel %vm754_vm9, 1.0, %v3876_v2  ;;  %v3119_v18 = vsel %vm755_vm10, 1.0, %v3876_v2  ;;  %v937_v23 = vpop.xlane.xlu0 %936 }
 0x26e   : > { %3887 = vst [vmem:[#allocation47_spill] sm:$0xff] %v3116_v5  ;;  %vm982_vm11 = vcmp.eq.f32.partialorder %v2980_v13, %v937_v23  ;;  %vm983_vm12 = vcmp.eq.f32.partialorder %v2983_v35, %v937_v23  ;;  %vm882_vm13 = vcmp.gt.f32.partialorder %v3116_v5, 0.0  ;;  %vm883_vm14 = vcmp.gt.f32.partialorder %v3119_v18, 0.0 }
 0x26f   : > { %3888 = vst [vmem:[#allocation48_spill] sm:$0xff] %v3119_v18  ;;  %v3126_v60 = vsel %vm882_vm13, -1e+30, %v2770_v6  ;;  %v3129_v27 = vsel %vm883_vm14, -1e+30, %v2775_v9  ;;  %v1014_v33 = vsel %vm982_vm11, %v2753_v48, 4.0 }
 0x270   : > { %v1015_v34 = vsel %vm983_vm12, %v2755_v51, 4.0  ;;  %v953_v49 = vmax.f32 %v3126_v60, %v3129_v27 }
 0x271   : > { %v1047_v13 = vmin.f32 %v1014_v33, %v1015_v34 }
 0x272   : > { %954 = vmax.xlane.f32.xlu2 %v953_v49 }
 0x273   : > { %1048 = vmin.xlane.f32.xlu1 %v1047_v13  ;;  %v718_v35 = vpop.xlane.xlu1 %717 }
 0x274   : > { %vm756_vm15 = vcmp.eq.f32.partialorder %v2753_v48, %v718_v35  ;;  %vm757_vm0 = vcmp.eq.f32.partialorder %v2755_v51, %v718_v35 }
 0x275   : > { %v3138_v6 = vsel %vm756_vm15, 1.0, %v3876_v2  ;;  %v3141_v9 = vsel %vm757_vm0, 1.0, %v3876_v2  ;;  %v940_v26 = vpop.xlane.xlu0 %939 }
 0x276   : > { %3889 = vst [vmem:[#allocation49_spill] sm:$0xff] %v3138_v6  ;;  %vm984_vm3 = vcmp.eq.f32.partialorder %v3002_v22, %v940_v26  ;;  %vm985_vm4 = vcmp.eq.f32.partialorder %v3005_v21, %v940_v26  ;;  %vm884_vm5 = vcmp.gt.f32.partialorder %v3138_v6, 0.0  ;;  %vm885_vm6 = vcmp.gt.f32.partialorder %v3141_v9, 0.0 }
 0x277   : > { %3890 = vst [vmem:[#allocation50_spill] sm:$0xff] %v3141_v9  ;;  %v3148_v40 = vsel %vm884_vm5, -1e+30, %v2792_v29  ;;  %v3151_v41 = vsel %vm885_vm6, -1e+30, %v2797_v30  ;;  %v1016_v43 = vsel %vm984_vm3, %v2753_v48, 4.0 }
 0x278   : > { %v1017_v23 = vsel %vm985_vm4, %v2755_v51, 4.0  ;;  %v956_v33 = vmax.f32 %v3148_v40, %v3151_v41 }
 0x279   : > { %v1050_v22 = vmin.f32 %v1016_v43, %v1017_v23 }
 0x27a   : > { %957 = vmax.xlane.f32.xlu2 %v956_v33 }
 0x27b   : > { %1051 = vmin.xlane.f32.xlu1 %v1050_v22  ;;  %v721_v21 = vpop.xlane.xlu1 %720 }
 0x27c   : > { %vm758_vm7 = vcmp.eq.f32.partialorder %v2753_v48, %v721_v21  ;;  %vm759_vm8 = vcmp.eq.f32.partialorder %v2755_v51, %v721_v21 }
 0x27d   : > { %v3160_v29 = vsel %vm758_vm7, 1.0, %v3876_v2  ;;  %v3163_v30 = vsel %vm759_vm8, 1.0, %v3876_v2  ;;  %v943_v34 = vpop.xlane.xlu0 %942 }
 0x27e   : > { %3891 = vst [vmem:[#allocation51_spill] sm:$0xff] %v3160_v29  ;;  %vm986_vm9 = vcmp.eq.f32.partialorder %v3024_v4, %v943_v34  ;;  %vm987_vm10 = vcmp.eq.f32.partialorder %v3027_v39, %v943_v34  ;;  %vm886_vm11 = vcmp.gt.f32.partialorder %v3160_v29, 0.0  ;;  %vm887_vm12 = vcmp.gt.f32.partialorder %v3163_v30, 0.0 }
 0x27f   : > { %3892 = vst [vmem:[#allocation52_spill] sm:$0xff] %v3163_v30  ;;  %v3170_v49 = vsel %vm886_vm11, -1e+30, %v2814_v46  ;;  %v3173_v13 = vsel %vm887_vm12, -1e+30, %v2819_v47  ;;  %v1018_v35 = vsel %vm986_vm9, %v2753_v48, 4.0 }
 0x280   : > { %v1019_v26 = vsel %vm987_vm10, %v2755_v51, 4.0  ;;  %v959_v43 = vmax.f32 %v3170_v49, %v3173_v13  ;;  %v1262_v30 = vmul.f32 0.044715, %v2715_v31  ;;  %v1221_v29 = vmul.f32 0.5, %v2623_v56 }
 0x281   : > { %v1053_v4 = vmin.f32 %v1018_v35, %v1019_v26 }
 0x282   : > { %960 = vmax.xlane.f32.xlu2 %v959_v43 }
 0x283   : > { %1054 = vmin.xlane.f32.xlu1 %v1053_v4  ;;  %v724_v39 = vpop.xlane.xlu1 %723 }
 0x284   : > { %vm760_vm13 = vcmp.eq.f32.partialorder %v2753_v48, %v724_v39  ;;  %vm761_vm14 = vcmp.eq.f32.partialorder %v2755_v51, %v724_v39  ;;  %v1587_v39 = vld [vmem:[#allocation10 + $0x78] sm:$0xff] }
 0x285   : > { %v3182_v46 = vsel %vm760_vm13, 1.0, %v3876_v2  ;;  %v3185_v47 = vsel %vm761_vm14, 1.0, %v3876_v2  ;;  %v946_v23 = vpop.xlane.xlu0 %945  ;;  %1604 = vmatpush.msra.mxu2 %v1587_v39 }
 0x286   : > { %3893 = vst [vmem:[#allocation53_spill] sm:$0xff] %v3182_v46  ;;  %vm988_vm15 = vcmp.eq.f32.partialorder %v3046_v3, %v946_v23  ;;  %vm989_vm0 = vcmp.eq.f32.partialorder %v3049_v44, %v946_v23  ;;  %vm888_vm3 = vcmp.gt.f32.partialorder %v3182_v46, 0.0  ;;  %vm889_vm4 = vcmp.gt.f32.partialorder %v3185_v47, 0.0  ;;  %v1603_v23 = vld [vmem:[#allocation10 + $0xf8] sm:$0xff] }
 0x287   : > { %3894 = vst [vmem:[#allocation54_spill] sm:$0xff] %v3185_v47  ;;  %v3192_v33 = vsel %vm888_vm3, -1e+30, %v2836_v15  ;;  %v3195_v22 = vsel %vm889_vm4, -1e+30, %v2841_v20  ;;  %v1020_v21 = vsel %vm988_vm15, %v2753_v48, 4.0  ;;  %1669 = vmatpush.msra.mxu3 %v1603_v23 }
 0x288   : > { %v1021_v34 = vsel %vm989_vm0, %v2755_v51, 4.0  ;;  %v962_v35 = vmax.f32 %v3192_v33, %v3195_v22 }
 0x289   : > { %v1056_v3 = vmin.f32 %v1020_v21, %v1021_v34 }
 0x28a   : > { %963 = vmax.xlane.f32.xlu2 %v962_v35 }
 0x28b   : > { %1057 = vmin.xlane.f32.xlu1 %v1056_v3  ;;  %v1585_v3 = vld [vmem:[#allocation10 + $0x68] sm:$0xff] }
 0x28d   : > { %v949_v44 = vpop.xlane.xlu2 %948  ;;  %v727_v26 = vpop.xlane.xlu0 %726 }
 0x28e   : > { %vm990_vm5 = vcmp.eq.f32.partialorder %v3068_v11, %v949_v44  ;;  %vm991_vm6 = vcmp.eq.f32.partialorder %v3071_v50, %v949_v44  ;;  %vm762_vm7 = vcmp.eq.f32.partialorder %v2753_v48, %v727_v26  ;;  %vm763_vm8 = vcmp.eq.f32.partialorder %v2755_v51, %v727_v26  ;;  %v1586_v11 = vld [vmem:[#allocation10 + $0x70] sm:$0xff]  ;;  %v1601_v26 = vld [vmem:[#allocation10 + $0xe8] sm:$0xff] }
 0x28f   : > { %v3206_v15 = vsel %vm762_vm7, 1.0, %v3876_v2  ;;  %v3209_v20 = vsel %vm763_vm8, 1.0, %v3876_v2  ;;  %v1022_v43 = vsel %vm990_vm5, %v2753_v48, 4.0  ;;  %v1023_v4 = vsel %vm991_vm6, %v2755_v51, 4.0  ;;  %v1602_v50 = vld [vmem:[#allocation10 + $0xf0] sm:$0xff]  ;;  %1605 = vmatpush.msra.mxu2 %v1586_v11 }
 0x290   : > { %3895 = vst [vmem:[#allocation55_spill] sm:$0xff] %v3206_v15  ;;  %v1059_v21 = vmin.f32 %v1022_v43, %v1023_v4  ;;  %vm890_vm9 = vcmp.gt.f32.partialorder %v3206_v15, 0.0  ;;  %vm891_vm10 = vcmp.gt.f32.partialorder %v3209_v20, 0.0  ;;  %1670 = vmatpush.msra.mxu3 %v1602_v50  ;;  %v1584_v43 = vld [vmem:[#allocation10 + $0x60] sm:$0xff]  ;;  %v1256_v15 = vmul.f32 0.044715, %v2658_v7 }
 0x291   : > { %3896 = vst [vmem:[#allocation56_spill] sm:$0xff] %v3209_v20  ;;  %v3216_v34 = vsel %vm890_vm9, -1e+30, %v2858_v62  ;;  %v3219_v35 = vsel %vm891_vm10, -1e+30, %v2863_v1  ;;  %1606 = vmatpush.msra.mxu2 %v1585_v3  ;;  %v1600_v4 = vld [vmem:[#allocation10 + $0xe0] sm:$0xff] }
 0x292   : > { %1060 = vmin.xlane.f32.xlu0 %v1059_v21  ;;  %v965_v44 = vmax.f32 %v3216_v34, %v3219_v35  ;;  %1671 = vmatpush.msra.mxu3 %v1601_v26  ;;  %v1583_v62 = vld [vmem:[#allocation10 + $0x58] sm:$0xff] }
 0x293   : > { %1607 = vmatpush.msra.mxu2 %v1584_v43  ;;  %v1599_v1 = vld [vmem:[#allocation10 + $0xd8] sm:$0xff] }
 0x294   : > { %966 = vmax.xlane.f32.xlu1 %v965_v44  ;;  %1672 = vmatpush.msra.mxu3 %v1600_v4 }
 0x295   : > { %v952_v39 = vpop.xlane.xlu2 %951  ;;  %v730_v23 = vpop.xlane.xlu0 %729  ;;  %1608 = vmatpush.msra.mxu2 %v1583_v62  ;;  %v1596_v62 = vld [vmem:[#allocation10 + $0xc0] sm:$0xff] }
 0x296   : > { %vm992_vm11 = vcmp.eq.f32.partialorder %v3090_v19, %v952_v39  ;;  %vm993_vm12 = vcmp.eq.f32.partialorder %v3093_v10, %v952_v39  ;;  %vm764_vm13 = vcmp.eq.f32.partialorder %v2753_v48, %v730_v23  ;;  %vm765_vm14 = vcmp.eq.f32.partialorder %v2755_v51, %v730_v23  ;;  %v1582_v19 = vld [vmem:[#allocation10 + $0x50] sm:$0xff]  ;;  %1673 = vmatpush.msra.mxu3 %v1599_v1  ;;  %v1581_v39 = vld [vmem:[#allocation10 + $0x48] sm:$0xff] }
 0x297   : > { %v3228_v21 = vsel %vm764_vm13, 1.0, %v3876_v2  ;;  %v3231_v11 = vsel %vm765_vm14, 1.0, %v3876_v2  ;;  %v1024_v50 = vsel %vm992_vm11, %v2753_v48, 4.0  ;;  %v1025_v3 = vsel %vm993_vm12, %v2755_v51, 4.0  ;;  %v1598_v10 = vld [vmem:[#allocation10 + $0xd0] sm:$0xff]  ;;  %1609 = vmatpush.msra.mxu2 %v1582_v19  ;;  %v1597_v23 = vld [vmem:[#allocation10 + $0xc8] sm:$0xff] }
 0x298   : > { %3897 = vst [vmem:[#allocation57_spill] sm:$0xff] %v3228_v21  ;;  %v1062_v44 = vmin.f32 %v1024_v50, %v1025_v3  ;;  %vm892_vm15 = vcmp.gt.f32.partialorder %v3228_v21, 0.0  ;;  %vm893_vm0 = vcmp.gt.f32.partialorder %v3231_v11, 0.0  ;;  %1674 = vmatpush.msra.mxu3 %v1598_v10  ;;  %v1580_v50 = vld [vmem:[#allocation10 + $0x40] sm:$0xff]  ;;  %v1594_v10 = vld [vmem:[#allocation10 + $0xb0] sm:$0xff] }
 0x299   : > { %3898 = vst [vmem:[#allocation58_spill] sm:$0xff] %v3231_v11  ;;  %v3238_v26 = vsel %vm892_vm15, -1e+30, %v2880_v14  ;;  %v3241_v43 = vsel %vm893_vm0, -1e+30, %v2885_v45  ;;  %1610 = vmatpush.msra.mxu2 %v1581_v39  ;;  %v1579_v14 = vld [vmem:[#allocation10 + $0x38] sm:$0xff] }
 0x29a   : > { %1063 = vmin.xlane.f32.xlu2 %v1062_v44  ;;  %v968_v4 = vmax.f32 %v3238_v26, %v3241_v43  ;;  %1675 = vmatpush.msra.mxu3 %v1597_v23  ;;  %v1595_v45 = vld [vmem:[#allocation10 + $0xb8] sm:$0xff]  ;;  %v1578_v44 = vld [vmem:[#allocation10 + $0x30] sm:$0xff]  ;;  %v1577_v23 = vld [vmem:[#allocation10 + $0x28] sm:$0xff] }
 0x29b   : > { %1611 = vmatpush.msra.mxu2 %v1580_v50  ;;  %v1572_v11 = vld [vmem:[#allocation10] sm:$0xff] }
 0x29c   : > { %969 = vmax.xlane.f32.xlu0 %v968_v4  ;;  %1676 = vmatpush.msra.mxu3 %v1596_v62  ;;  %v1593_v62 = vld [vmem:[#allocation10 + $0xa8] sm:$0xff]  ;;  %v1588_v21 = vld [vmem:[#allocation10 + $0x80] sm:$0xff] }
 0x29d   : > { %v733_v3 = vpop.xlane.xlu0 %732  ;;  %1612 = vmatpush.msra.mxu2 %v1579_v14  ;;  %v1575_v14 = vld [vmem:[#allocation10 + $0x18] sm:$0xff] }
 0x29e   : > { %vm766_vm3 = vcmp.eq.f32.partialorder %v2753_v48, %v733_v3  ;;  %vm767_vm4 = vcmp.eq.f32.partialorder %v2755_v51, %v733_v3  ;;  %1677 = vmatpush.msra.mxu3 %v1595_v45  ;;  %v1576_v3 = vld [vmem:[#allocation10 + $0x20] sm:$0xff]  ;;  %v1253_v45 = vmul.f32 0.044715, %v2623_v56 }
 0x29f   : > { %v3248_v1 = vsel %vm766_vm3, 1.0, %v3876_v2  ;;  %v3251_v19 = vsel %vm767_vm4, 1.0, %v3876_v2  ;;  %1613 = vmatpush.msra.mxu2 %v1578_v44  ;;  %v1255_v44 = vmul.f32 0.044715, %v2642_v0 }
 0x2a0   : > { %3899 = vst [vmem:[#allocation59_spill] sm:$0xff] %v3248_v1  ;;  %vm894_vm5 = vcmp.gt.f32.partialorder %v3248_v1, 0.0  ;;  %vm895_vm6 = vcmp.gt.f32.partialorder %v3251_v19, 0.0  ;;  %1678 = vmatpush.msra.mxu3 %v1594_v10  ;;  %v1254_v1 = vmul.f32 0.044715, %v2639_v63 }
 0x2a1   : > { %3900 = vst [vmem:[#allocation60_spill] sm:$0xff] %v3251_v19  ;;  %v3256_v39 = vsel %vm894_vm5, -1e+30, %v2902_v28  ;;  %v3259_v4 = vsel %vm895_vm6, -1e+30, %v2907_v12  ;;  %1614 = vmatpush.msra.mxu2 %v1577_v23  ;;  %v1592_v19 = vld [vmem:[#allocation10 + $0xa0] sm:$0xff]  ;;  %v1285_v23 = vmul.f32 %v1253_v45, %v2623_v56 }
 0x2a2   : > { %3901 = vst [vmem:[#allocation61_spill] sm:$0xff] %v3259_v4  ;;  %v971_v50 = vmax.f32 %v3256_v39, %v3259_v4  ;;  %1679 = vmatpush.msra.mxu3 %v1593_v62  ;;  %v1591_v28 = vld [vmem:[#allocation10 + $0x98] sm:$0xff]  ;;  %v1252_v12 = vmul.f32 0.044715, %v2620_v55  ;;  %v1590_v62 = vld [vmem:[#allocation10 + $0x90] sm:$0xff] }
 0x2a3   : > { %1615 = vmatpush.msra.mxu2 %v1576_v3  ;;  %v1286_v3 = vmul.f32 %v1254_v1, %v2639_v63  ;;  %v1257_v45 = vmul.f32 0.044715, %v2661_v8 }
 0x2a4   : > { %972 = vmax.xlane.f32.xlu2 %v971_v50  ;;  %1680 = vmatpush.msra.mxu3 %v1592_v19  ;;  %v1284_v10 = vmul.f32 %v1252_v12, %v2620_v55  ;;  %v1574_v50 = vld [vmem:[#allocation10 + $0x10] sm:$0xff]  ;;  %v1573_v19 = vld [vmem:[#allocation10 + $0x8] sm:$0xff]  ;;  %v1317_v12 = vmul.f32 %v1285_v23, %v2623_v56 }
 0x2a5   : > { %1616 = vmatpush.msra.mxu2 %v1575_v14  ;;  %v1589_v14 = vld [vmem:[#allocation10 + $0x88] sm:$0xff]  ;;  %v1318_v1 = vmul.f32 %v1286_v3, %v2639_v63  ;;  %v1289_v47 = vmul.f32 %v1257_v45, %v2661_v8  ;;  %v1259_v45 = vmul.f32 0.044715, %v2681_v17  ;;  %v736_v18 = vpop.xlane.xlu0 %735 }
 0x2a6   : > { %1681 = vmatpush.msra.mxu3 %v1591_v28  ;;  %v1287_v28 = vmul.f32 %v1255_v44, %v2642_v0  ;;  %v1316_v20 = vmul.f32 %v1284_v10, %v2620_v55  ;;  %v1349_v10 = vadd.f32 %v1317_v12, %v2623_v56  ;;  %vm768_vm9 = vcmp.eq.f32.partialorder %v2753_v48, %v736_v18 }
 0x2a7   : > { %1617 = vmatpush.msra.mxu2 %v1574_v50  ;;  %vm769_vm10 = vcmp.eq.f32.partialorder %v2755_v51, %v736_v18 }
 0x2a8   : > { %1682 = vmatpush.msra.mxu3 %v1590_v62  ;;  %v1319_v50 = vmul.f32 %v1287_v28, %v2642_v0  ;;  %v1348_v44 = vadd.f32 %v1316_v20, %v2620_v55  ;;  %v1288_v62 = vmul.f32 %v1256_v15, %v2658_v7  ;;  %v1381_v3 = vmul.f32 0.7978846, %v1349_v10 }
 0x2a9   : > { %1618 = vmatpush.msra.mxu2 %v1573_v19  ;;  %v1350_v19 = vadd.f32 %v1318_v1, %v2639_v63  ;;  %v1258_v20 = vmul.f32 0.044715, %v2678_v16 }
 0x2aa   : > { %1683 = vmatpush.msra.mxu3 %v1589_v14  ;;  %v1351_v23 = vadd.f32 %v1319_v50, %v2642_v0  ;;  %v1380_v14 = vmul.f32 0.7978846, %v1348_v44  ;;  %v1320_v46 = vmul.f32 %v1288_v62, %v2658_v7 }
 0x2ab   : > { %1619 = vmatpush.msra.mxu2 %v1572_v11  ;;  %v1382_v11 = vmul.f32 0.7978846, %v1350_v19  ;;  %v1290_v1 = vmul.f32 %v1258_v20, %v2678_v16 }
 0x2ac   : > { %1684 = vmatpush.msra.mxu3 %v1588_v21  ;;  %v1321_v21 = vmul.f32 %v1289_v47, %v2661_v8  ;;  %v1383_v28 = vmul.f32 0.7978846, %v1351_v23  ;;  %2070 = vtanh.f32 %v1380_v14  ;;  %v1352_v15 = vadd.f32 %v1320_v46, %v2658_v7 }
 0x2ad   : > { %2072 = vtanh.f32 %v1381_v3  ;;  %v1291_v47 = vmul.f32 %v1259_v45, %v2681_v17  ;;  %v1322_v19 = vmul.f32 %v1290_v1, %v2678_v16  ;;  %v1260_v23 = vmul.f32 0.044715, %v2697_v24 }
 0x2ae   : > { %v1353_v12 = vadd.f32 %v1321_v21, %v2661_v8  ;;  %2074 = vtanh.f32 %v1382_v11  ;;  %v1384_v50 = vmul.f32 0.7978846, %v1352_v15  ;;  %v1261_v14 = vmul.f32 0.044715, %v2700_v25 }
 0x2af   : > { %2076 = vtanh.f32 %v1383_v28  ;;  %v1323_v21 = vmul.f32 %v1291_v47, %v2681_v17  ;;  %v1354_v20 = vadd.f32 %v1322_v19, %v2678_v16  ;;  %v1292_v15 = vmul.f32 %v1260_v23, %v2697_v24 }
 0x2b0   : > { %v1385_v44 = vmul.f32 0.7978846, %v1353_v12  ;;  %2078 = vtanh.f32 %v1384_v50  ;;  %v1293_v1 = vmul.f32 %v1261_v14, %v2700_v25  ;;  %v1220_v50 = vmul.f32 0.5, %v2620_v55 }
 0x2b1   : > { %v1263_v47 = vmul.f32 0.044715, %v2718_v32  ;;  %v1223_v19 = vmul.f32 0.5, %v2642_v0  ;;  %v1386_v9 = vmul.f32 0.7978846, %v1354_v20  ;;  %v1324_v14 = vmul.f32 %v1292_v15, %v2697_v24 }
 0x2b2   : > { %v2071_v62 = vpop.eup %2070  ;;  %2080 = vtanh.f32 %v1385_v44  ;;  %v1355_v44 = vadd.f32 %v1323_v21, %v2681_v17  ;;  %v1325_v56 = vmul.f32 %v1293_v1, %v2700_v25  ;;  %v1294_v21 = vmul.f32 %v1262_v30, %v2715_v31 }
 0x2b3   : > { %v2073_v10 = vpop.eup %2072  ;;  %v1444_v11 = vadd.f32 1.0, %v2071_v62  ;;  %2082 = vtanh.f32 %v1386_v9  ;;  %v1356_v30 = vadd.f32 %v1324_v14, %v2697_v24 }
 0x2b4   : > { %v2075_v46 = vpop.eup %2074  ;;  %v1445_v28 = vadd.f32 1.0, %v2073_v10  ;;  %v1222_v10 = vmul.f32 0.5, %v2639_v63  ;;  %v1224_v63 = vmul.f32 0.5, %v2658_v7  ;;  %v1387_v0 = vmul.f32 0.7978846, %v1355_v44 }
 0x2b5   : > { %v2077_v3 = vpop.eup %2076  ;;  %v1446_v12 = vadd.f32 1.0, %v2075_v46  ;;  %v1476_v46 = vmul.f32 %v1444_v11, %v1220_v50  ;;  %v1295_v11 = vmul.f32 %v1263_v47, %v2718_v32  ;;  %v1326_v1 = vmul.f32 %v1294_v21, %v2715_v31  ;;  %v739_v21 = vpop.xlane.xlu0 %738 }
 0x2b6   : > { %v1447_v45 = vadd.f32 1.0, %v2077_v3  ;;  %v2079_v62 = vpop.eup %2078  ;;  %v1477_v3 = vmul.f32 %v1445_v28, %v1221_v29  ;;  %v1225_v29 = vmul.f32 0.5, %v2661_v8  ;;  %2084 = vtanh.f32 %v1387_v0 }
 0x2b7   : > { %v3306_v6 = vmul.f32 %v1446_v12, %v1222_v10  ;;  %v1448_v4 = vadd.f32 1.0, %v2079_v62  ;;  %v1327_v50 = vmul.f32 %v1295_v11, %v2718_v32  ;;  %v1388_v10 = vmul.f32 0.7978846, %v1356_v30 }
 0x2b8   : > { %v2081_v23 = vpop.eup %2080  ;;  %v3308_v55 = vmul.f32 %v1447_v45, %v1223_v19  ;;  %v1357_v45 = vadd.f32 %v1325_v56, %v2700_v25  ;;  %v1509_v8 = vsel %vm2615_vm2, 1.0, %v1477_v3  ;;  %v1358_v18 = vadd.f32 %v1326_v1, %v2715_v31 }
 0x2b9   : > { %v1449_v28 = vadd.f32 1.0, %v2081_v23  ;;  %v3337_v47 = vmul.f32 %v1448_v4, %v1224_v63  ;;  %v2083_v23 = vpop.eup %2082  ;;  %v1359_v4 = vadd.f32 %v1327_v50, %v2718_v32  ;;  %v1226_v30 = vmul.f32 0.5, %v2678_v16 }
 0x2ba   : > { %v1511_v44 = vsel %vm2615_vm2, 1.0, %v3308_v55  ;;  %v1389_v19 = vmul.f32 0.7978846, %v1357_v45  ;;  %v1264_v55 = vmul.f32 0.044715, %v2733_v38  ;;  %2086 = vtanh.f32 %v1388_v10 }
 0x2bb   : > { %v3339_v62 = vmul.f32 %v1449_v28, %v1225_v29  ;;  %vm770_vm3 = vcmp.eq.f32.partialorder %v2753_v48, %v739_v21  ;;  %vm771_vm4 = vcmp.eq.f32.partialorder %v2755_v51, %v739_v21  ;;  %v1450_v45 = vadd.f32 1.0, %v2083_v23 }
 0x2bc   : > { %v2085_v56 = vpop.eup %2084  ;;  %2088 = vtanh.f32 %v1389_v19  ;;  %v1390_v1 = vmul.f32 0.7978846, %v1358_v18  ;;  %v3370_v50 = vsel %vm770_vm3, 1.0, %v3876_v2 }
 0x2bd   : > { %v1513_v21 = vsel %vm2615_vm2, 1.0, %v3339_v62 }
 0x2be   : > { %2090 = vtanh.f32 %v1390_v1  ;;  %v3905_v1 = vld [vmem:[#allocation39_spill] sm:$0xff] }
 0x2c0   : > { %v2087_v10 = vpop.eup %2086 }
 0x2c1   : > { %v1452_v62 = vadd.f32 1.0, %v2087_v10 }
 0x2dd   : > { %v1046_v5 = vpop.xlane.xlu1 %1045 }
 0x2de   : > { %vm1092_vm7 = vcmp.eq.f32.partialorder %v2753_v48, %v1046_v5  ;;  %vm1093_vm8 = vcmp.eq.f32.partialorder %v2755_v51, %v1046_v5  ;;  %v1508_v5 = vsel %vm2611_vm1, 1.0, %v1476_v46  ;;  %v3343_v46 = vsel %vm768_vm9, 1.0, %v3876_v2 }
 0x2df   : > { %v1937_v20 = vsel %vm1092_vm7, 1.0, %v3876_v2  ;;  %v1938_v15 = vsel %vm1093_vm8, 1.0, %v3876_v2  ;;  %vm896_vm15 = vcmp.gt.f32.partialorder %v3343_v46, 0.0  ;;  %vm898_vm9 = vcmp.gt.f32.partialorder %v3370_v50, 0.0 }
 0x2e0   : > { %v1188_v7 = vadd.f32 %v1937_v20, %v2950_v42  ;;  %v1189_v12 = vadd.f32 %v1938_v15, %v2953_v57  ;;  %v1510_v57 = vsel %vm2611_vm1, 1.0, %v3306_v6  ;;  %v3346_v6 = vsel %vm769_vm10, 1.0, %v3876_v2 }
 0x2e1   : > { %vm897_vm0 = vcmp.gt.f32.partialorder %v3346_v6, 0.0 }
 0x2e2   : > { %v1540_v42 = vmul.f32 %v1508_v5, %v1188_v7  ;;  %v1541_v9 = vmul.f32 %v1509_v8, %v1189_v12  ;;  %v1391_v5 = vmul.f32 0.7978846, %v1359_v4  ;;  %v1296_v8 = vmul.f32 %v1264_v55, %v2733_v38  ;;  %v2089_v55 = vpop.eup %2088 }
 0x2e4   : > { %1620 = vmatmul.f32.vlgmr.msra.gmra.mxu2 %v1540_v42  ;;  %1685 = vmatmul.f32.vlgmr.msra.gmra.mxu3 %v1541_v9  ;;  %v3373_v42 = vsel %vm771_vm4, 1.0, %v3876_v2  ;;  %2092 = vtanh.f32 %v1391_v5  ;;  %v3906_v5 = vld [vmem:[#allocation40_spill] sm:$0xff] }
 0x2e5   : > { %v955_v3 = vpop.xlane.xlu2 %954  ;;  %vm899_vm10 = vcmp.gt.f32.partialorder %v3373_v42, 0.0 }
 0x2e6   : > { %v1049_v14 = vpop.xlane.xlu1 %1048  ;;  %vm994_vm11 = vcmp.eq.f32.partialorder %v3126_v60, %v955_v3  ;;  %vm995_vm12 = vcmp.eq.f32.partialorder %v3129_v27, %v955_v3  ;;  %v3902_v27 = vld [vmem:[#allocation18_spill] sm:$0xff] }
 0x2e7   : > { %vm1094_vm13 = vcmp.eq.f32.partialorder %v2753_v48, %v1049_v14  ;;  %vm1095_vm14 = vcmp.eq.f32.partialorder %v2755_v51, %v1049_v14  ;;  %v1026_v11 = vsel %vm994_vm11, %v2753_v48, 4.0  ;;  %v1027_v29 = vsel %vm995_vm12, %v2755_v51, 4.0 }
 0x2e8   : > { %v1939_v63 = vsel %vm1094_vm13, 1.0, %v3876_v2  ;;  %v1940_v0 = vsel %vm1095_vm14, 1.0, %v3876_v2  ;;  %v1065_v28 = vmin.f32 %v1026_v11, %v1027_v29  ;;  %v1265_v15 = vmul.f32 0.044715, %v3902_v27 }
 0x2e9   : > { %v1190_v20 = vadd.f32 %v1939_v63, %v2970_v58  ;;  %v1191_v60 = vadd.f32 %v1940_v0, %v2973_v59  ;;  %v1227_v58 = vmul.f32 0.5, %v2681_v17  ;;  %v1451_v59 = vadd.f32 1.0, %v2085_v56 }
 0x2ea   : > { %1066 = vmin.xlane.f32.xlu1 %v1065_v28  ;;  %v1297_v16 = vmul.f32 %v1265_v15, %v3902_v27  ;;  %v3378_v17 = vsel %vm896_vm15, -1e+30, %v2920_v36  ;;  %v1512_v56 = vsel %vm2611_vm1, 1.0, %v3337_v47  ;;  %v1328_v63 = vmul.f32 %v1296_v8, %v2733_v38 }
 0x2eb   : > { %v1542_v7 = vmul.f32 %v1510_v57, %v1190_v20  ;;  %v1543_v12 = vmul.f32 %v1511_v44, %v1191_v60  ;;  %v3383_v44 = vsel %vm897_vm0, -1e+30, %v2925_v52  ;;  %v1482_v28 = vmul.f32 %v1450_v45, %v1226_v30 }
 0x2ec   : > { %v974_v52 = vmax.f32 %v3378_v17, %v3383_v44  ;;  %v1329_v0 = vmul.f32 %v1297_v16, %v3902_v27  ;;  %v1483_v20 = vmul.f32 %v1451_v59, %v1227_v58  ;;  %v1228_v47 = vmul.f32 0.5, %v2697_v24 }
 0x2ed   : > { %1623 = vmatmul.f32.gmra.mxu2 %v1542_v7  ;;  %1688 = vmatmul.f32.gmra.mxu3 %v1543_v12  ;;  %v958_v9 = vpop.xlane.xlu2 %957  ;;  %v1229_v60 = vmul.f32 0.5, %v2700_v25  ;;  %v1453_v15 = vadd.f32 1.0, %v2089_v55  ;;  %v3410_v8 = vsel %vm898_vm9, -1e+30, %v2938_v61  ;;  %v3413_v16 = vsel %vm899_vm10, -1e+30, %v2943_v37 }
 0x2ee   : > { %v1052_v57 = vpop.xlane.xlu1 %1051  ;;  %vm996_vm5 = vcmp.eq.f32.partialorder %v3148_v40, %v958_v9  ;;  %vm997_vm6 = vcmp.eq.f32.partialorder %v3151_v41, %v958_v9  ;;  %v3903_v40 = vld [vmem:[#allocation37_spill] sm:$0xff]  ;;  %v3904_v41 = vld [vmem:[#allocation38_spill] sm:$0xff]  ;;  %v1360_v30 = vadd.f32 %v1328_v63, %v2733_v38  ;;  %v1361_v24 = vadd.f32 %v1329_v0, %v3902_v27  ;;  %v2091_v9 = vpop.eup %2090 }
 0x2ef   : > { %vm1096_vm7 = vcmp.eq.f32.partialorder %v2753_v48, %v1052_v57  ;;  %vm1097_vm8 = vcmp.eq.f32.partialorder %v2755_v51, %v1052_v57  ;;  %v1028_v36 = vsel %vm996_vm5, %v2753_v48, 4.0  ;;  %v1029_v23 = vsel %vm997_vm6, %v2755_v51, 4.0 }
 0x2f0   : > { %v1941_v19 = vsel %vm1096_vm7, 1.0, %v3876_v2  ;;  %v1942_v18 = vsel %vm1097_vm8, 1.0, %v3876_v2  ;;  %v1068_v3 = vmin.f32 %v1028_v36, %v1029_v23  ;;  %v977_v59 = vmax.f32 %v3410_v8, %v3413_v16 }
 0x2f1   : > { %v1192_v14 = vadd.f32 %v1941_v19, %v3903_v40  ;;  %v1193_v4 = vadd.f32 %v1942_v18, %v3904_v41  ;;  %v1514_v57 = vsel %vm2611_vm1, 1.0, %v1482_v28  ;;  %v1515_v10 = vsel %vm2615_vm2, 1.0, %v1483_v20  ;;  %v2093_v18 = vpop.eup %2092  ;;  %v3908_v20 = vld [vmem:[#allocation42_spill] sm:$0xff] }
 0x2f2   : > { %1069 = vmin.xlane.f32.xlu0 %v1068_v3  ;;  %975 = vmax.xlane.f32.xlu1 %v974_v52  ;;  %v1392_v19 = vmul.f32 0.7978846, %v1360_v30  ;;  %v1484_v3 = vmul.f32 %v1452_v62, %v1228_v47  ;;  %v1485_v52 = vmul.f32 %v1453_v15, %v1229_v60  ;;  %v1230_v40 = vmul.f32 0.5, %v2715_v31 }
 0x2f3   : > { %v1544_v11 = vmul.f32 %v1512_v56, %v1192_v14  ;;  %v1545_v29 = vmul.f32 %v1513_v21, %v1193_v4  ;;  %v1393_v14 = vmul.f32 0.7978846, %v1361_v24  ;;  %v1454_v55 = vadd.f32 1.0, %v2091_v9 }
 0x2f4   : > { %v1231_v56 = vmul.f32 0.5, %v2718_v32  ;;  %v1455_v21 = vadd.f32 1.0, %v2093_v18  ;;  %2094 = vtanh.f32 %v1392_v19  ;;  %v3907_v32 = vld [vmem:[#allocation41_spill] sm:$0xff] }
 0x2f5   : > { %1626 = vmatmul.f32.gmra.mxu2 %v1544_v11  ;;  %1691 = vmatmul.f32.gmra.mxu3 %v1545_v29  ;;  %v961_v7 = vpop.xlane.xlu2 %960  ;;  %2096 = vtanh.f32 %v1393_v14  ;;  %v1486_v15 = vmul.f32 %v1454_v55, %v1230_v40  ;;  %v3911_v14 = vld [vmem:[#allocation45_spill] sm:$0xff] }
 0x2f6   : > { %v1055_v12 = vpop.xlane.xlu1 %1054  ;;  %vm998_vm11 = vcmp.eq.f32.partialorder %v3170_v49, %v961_v7  ;;  %vm999_vm12 = vcmp.eq.f32.partialorder %v3173_v13, %v961_v7  ;;  %v1487_v7 = vmul.f32 %v1455_v21, %v1231_v56 }
 0x2f7   : > { %vm1098_vm13 = vcmp.eq.f32.partialorder %v2753_v48, %v1055_v12  ;;  %vm1099_vm14 = vcmp.eq.f32.partialorder %v2755_v51, %v1055_v12  ;;  %v1030_v45 = vsel %vm998_vm11, %v2753_v48, 4.0  ;;  %v1031_v37 = vsel %vm999_vm12, %v2755_v51, 4.0 }
 0x2f8   : > { %v1943_v25 = vsel %vm1098_vm13, 1.0, %v3876_v2  ;;  %v1944_v61 = vsel %vm1099_vm14, 1.0, %v3876_v2  ;;  %v1071_v58 = vmin.f32 %v1030_v45, %v1031_v37 }
 0x2f9   : > { %v1194_v49 = vadd.f32 %v1943_v25, %v3905_v1  ;;  %v1195_v13 = vadd.f32 %v1944_v61, %v3906_v5  ;;  %v1518_v25 = vsel %vm2611_vm1, 1.0, %v1486_v15  ;;  %v1519_v61 = vsel %vm2615_vm2, 1.0, %v1487_v7  ;;  %v3916_v7 = vld [vmem:[#allocation21_spill] sm:$0xff] }
 0x2fa   : > { %1072 = vmin.xlane.f32.xlu2 %v1071_v58  ;;  %978 = vmax.xlane.f32.xlu0 %v977_v59  ;;  %v2095_v12 = vpop.eup %2094  ;;  %v1232_v59 = vmul.f32 0.5, %v2733_v38  ;;  %v1233_v1 = vmul.f32 0.5, %v3902_v27 }
 0x2fb   : > { %v1546_v36 = vmul.f32 %v1514_v57, %v1194_v49  ;;  %v1547_v23 = vmul.f32 %v1515_v10, %v1195_v13  ;;  %v2097_v24 = vpop.eup %2096  ;;  %v3909_v49 = vld [vmem:[#allocation43_spill] sm:$0xff]  ;;  %v3910_v13 = vld [vmem:[#allocation44_spill] sm:$0xff]  ;;  %v1456_v19 = vadd.f32 1.0, %v2095_v12  ;;  %v1268_v12 = vmul.f32 0.044715, %v3916_v7 }
 0x2fc   : > { %v1457_v18 = vadd.f32 1.0, %v2097_v24 }
 0x2fd   : > { %1629 = vmatmul.f32.gmra.mxu2 %v1546_v36  ;;  %1694 = vmatmul.f32.gmra.mxu3 %v1547_v23  ;;  %v964_v41 = vpop.xlane.xlu2 %963 }
 0x2fe   : > { %v1058_v4 = vpop.xlane.xlu1 %1057  ;;  %vm1000_vm15 = vcmp.eq.f32.partialorder %v3192_v33, %v964_v41  ;;  %vm1001_vm0 = vcmp.eq.f32.partialorder %v3195_v22, %v964_v41  ;;  %v1516_v33 = vsel %vm2611_vm1, 1.0, %v1484_v3  ;;  %v1517_v22 = vsel %vm2615_vm2, 1.0, %v1485_v52 }
 0x2ff   : > { %vm1100_vm3 = vcmp.eq.f32.partialorder %v2753_v48, %v1058_v4  ;;  %vm1101_vm4 = vcmp.eq.f32.partialorder %v2755_v51, %v1058_v4  ;;  %v1032_v0 = vsel %vm1000_vm15, %v2753_v48, 4.0  ;;  %v1033_v11 = vsel %vm1001_vm0, %v2755_v51, 4.0  ;;  %v3912_v4 = vld [vmem:[#allocation46_spill] sm:$0xff] }
 0x300   : > { %v1945_v63 = vsel %vm1100_vm3, 1.0, %v3876_v2  ;;  %v1946_v31 = vsel %vm1101_vm4, 1.0, %v3876_v2  ;;  %v1074_v29 = vmin.f32 %v1032_v0, %v1033_v11  ;;  %v1489_v27 = vmul.f32 %v1457_v18, %v1233_v1 }
 0x301   : > { %v1196_v28 = vadd.f32 %v1945_v63, %v3907_v32  ;;  %v1197_v47 = vadd.f32 %v1946_v31, %v3908_v20 }
 0x302   : > { %1075 = vmin.xlane.f32.xlu1 %v1074_v29  ;;  %v1521_v21 = vsel %vm2615_vm2, 1.0, %v1489_v27  ;;  %v3920_v27 = vld [vmem:[#allocation25_spill] sm:$0xff] }
 0x303   : > { %v1548_v62 = vmul.f32 %v1516_v33, %v1196_v28  ;;  %v1549_v60 = vmul.f32 %v1517_v22, %v1197_v47  ;;  %v3914_v47 = vld [vmem:[#allocation19_spill] sm:$0xff]  ;;  %v3915_v22 = vld [vmem:[#allocation20_spill] sm:$0xff] }
 0x304   : > { %v1266_v33 = vmul.f32 0.044715, %v3914_v47 }
 0x305   : > { %1632 = vmatmul.f32.gmra.mxu2 %v1548_v62  ;;  %1697 = vmatmul.f32.gmra.mxu3 %v1549_v60  ;;  %v1061_v30 = vpop.xlane.xlu0 %1060  ;;  %v1267_v62 = vmul.f32 0.044715, %v3915_v22 }
 0x306   : > { %vm1102_vm5 = vcmp.eq.f32.partialorder %v2753_v48, %v1061_v30  ;;  %vm1103_vm6 = vcmp.eq.f32.partialorder %v2755_v51, %v1061_v30  ;;  %v1298_v60 = vmul.f32 %v1266_v33, %v3914_v47  ;;  %v3917_v30 = vld [vmem:[#allocation22_spill] sm:$0xff]  ;;  %v3922_v33 = vld [vmem:[#allocation27_spill] sm:$0xff] }
 0x307   : > { %v1947_v45 = vsel %vm1102_vm5, 1.0, %v3876_v2  ;;  %v1948_v37 = vsel %vm1103_vm6, 1.0, %v3876_v2  ;;  %v967_v58 = vpop.xlane.xlu1 %966  ;;  %v1299_v15 = vmul.f32 %v1267_v62, %v3915_v22  ;;  %v1274_v62 = vmul.f32 0.044715, %v3922_v33 }
 0x308   : > { %vm1002_vm7 = vcmp.eq.f32.partialorder %v3216_v34, %v967_v58  ;;  %vm1003_vm8 = vcmp.eq.f32.partialorder %v3219_v35, %v967_v58  ;;  %v1198_v5 = vadd.f32 %v1947_v45, %v3909_v49  ;;  %v1199_v9 = vadd.f32 %v1948_v37, %v3910_v13  ;;  %v3919_v58 = vld [vmem:[#allocation24_spill] sm:$0xff] }
 0x309   : > { %v1034_v57 = vsel %vm1002_vm7, %v2753_v48, 4.0  ;;  %v1035_v10 = vsel %vm1003_vm8, %v2755_v51, 4.0  ;;  %v1488_v34 = vmul.f32 %v1456_v19, %v1232_v59  ;;  %v1330_v24 = vmul.f32 %v1298_v60, %v3914_v47  ;;  %v3923_v60 = vld [vmem:[#allocation28_spill] sm:$0xff] }
 0x30a   : > { %v1077_v36 = vmin.f32 %v1034_v57, %v1035_v10  ;;  %v1550_v23 = vmul.f32 %v1518_v25, %v1198_v5  ;;  %v1551_v3 = vmul.f32 %v1519_v61, %v1199_v9  ;;  %v3918_v25 = vld [vmem:[#allocation23_spill] sm:$0xff]  ;;  %v1331_v45 = vmul.f32 %v1299_v15, %v3915_v22 }
 0x30b   : > { %v1520_v56 = vsel %vm2611_vm1, 1.0, %v1488_v34  ;;  %v1270_v61 = vmul.f32 0.044715, %v3918_v25  ;;  %v1300_v37 = vmul.f32 %v1268_v12, %v3916_v7  ;;  %v1271_v59 = vmul.f32 0.044715, %v3919_v58 }
 0x30c   : > { %1078 = vmin.xlane.f32.xlu2 %v1077_v36  ;;  %v1362_v49 = vadd.f32 %v1330_v24, %v3914_v47  ;;  %v1363_v13 = vadd.f32 %v1331_v45, %v3915_v22  ;;  %v1275_v15 = vmul.f32 0.044715, %v3923_v60 }
 0x30d   : > { %1635 = vmatmul.f32.gmra.mxu2 %v1550_v23  ;;  %1700 = vmatmul.f32.gmra.mxu3 %v1551_v3  ;;  %v1064_v38 = vpop.xlane.xlu2 %1063  ;;  %v1302_v5 = vmul.f32 %v1270_v61, %v3918_v25  ;;  %v1332_v9 = vmul.f32 %v1300_v37, %v3916_v7  ;;  %v1303_v57 = vmul.f32 %v1271_v59, %v3919_v58 }
 0x30e   : > { %vm1104_vm9 = vcmp.eq.f32.partialorder %v2753_v48, %v1064_v38  ;;  %vm1105_vm10 = vcmp.eq.f32.partialorder %v2755_v51, %v1064_v38  ;;  %v1394_v19 = vmul.f32 0.7978846, %v1362_v49  ;;  %v1395_v36 = vmul.f32 0.7978846, %v1363_v13 }
 0x30f   : > { %v1949_v35 = vsel %vm1104_vm9, 1.0, %v3876_v2  ;;  %v1950_v52 = vsel %vm1105_vm10, 1.0, %v3876_v2  ;;  %v970_v40 = vpop.xlane.xlu0 %969  ;;  %v1334_v18 = vmul.f32 %v1302_v5, %v3918_v25  ;;  %v1364_v23 = vadd.f32 %v1332_v9, %v3916_v7 }
 0x310   : > { %vm1004_vm11 = vcmp.eq.f32.partialorder %v3238_v26, %v970_v40  ;;  %vm1005_vm12 = vcmp.eq.f32.partialorder %v3241_v43, %v970_v40  ;;  %v1200_v41 = vadd.f32 %v1949_v35, %v3911_v14  ;;  %v1201_v55 = vadd.f32 %v1950_v52, %v3912_v4  ;;  %v3913_v43 = vld [vmem:[#allocation61_spill] sm:$0xff] }
 0x311   : > { %v1036_v63 = vsel %vm1004_vm11, %v2753_v48, 4.0  ;;  %v1037_v31 = vsel %vm1005_vm12, %v2755_v51, 4.0  ;;  %v1335_v3 = vmul.f32 %v1303_v57, %v3919_v58  ;;  %2098 = vtanh.f32 %v1394_v19 }
 0x312   : > { %v1552_v0 = vmul.f32 %v1520_v56, %v1200_v41  ;;  %v1553_v11 = vmul.f32 %v1521_v21, %v1201_v55  ;;  %v1080_v29 = vmin.f32 %v1036_v63, %v1037_v31  ;;  %v1366_v34 = vadd.f32 %v1334_v18, %v3918_v25  ;;  %v3921_v41 = vld [vmem:[#allocation26_spill] sm:$0xff] }
 0x313   : > { %v1272_v35 = vmul.f32 0.044715, %v3920_v27  ;;  %2100 = vtanh.f32 %v1395_v36  ;;  %v1396_v52 = vmul.f32 0.7978846, %v1364_v23  ;;  %v1367_v40 = vadd.f32 %v1335_v3, %v3919_v58  ;;  %v3925_v3 = vld [vmem:[#allocation48_spill] sm:$0xff] }
 0x314   : > { %1081 = vmin.xlane.f32.xlu0 %v1080_v29  ;;  %v1273_v4 = vmul.f32 0.044715, %v3921_v41  ;;  %v1398_v55 = vmul.f32 0.7978846, %v1366_v34  ;;  %v1234_v29 = vmul.f32 0.5, %v3914_v47  ;;  %v1236_v47 = vmul.f32 0.5, %v3916_v7 }
 0x315   : > { %1638 = vmatmul.f32.gmra.mxu2 %v1552_v0  ;;  %1703 = vmatmul.f32.gmra.mxu3 %v1553_v11  ;;  %v1304_v56 = vmul.f32 %v1272_v35, %v3920_v27  ;;  %2102 = vtanh.f32 %v1396_v52  ;;  %v1399_v21 = vmul.f32 0.7978846, %v1367_v40  ;;  %v1237_v49 = vmul.f32 0.5, %v3917_v30 }
 0x316   : > { %v1305_v31 = vmul.f32 %v1273_v4, %v3921_v41  ;;  %v1306_v13 = vmul.f32 %v1274_v62, %v3922_v33  ;;  %v1307_v9 = vmul.f32 %v1275_v15, %v3923_v60  ;;  %v1238_v57 = vmul.f32 0.5, %v3918_v25 }
 0x317   : > { %v973_v26 = vpop.xlane.xlu2 %972  ;;  %v2099_v63 = vpop.eup %2098  ;;  %v1336_v11 = vmul.f32 %v1304_v56, %v3920_v27  ;;  %v1239_v36 = vmul.f32 0.5, %v3919_v58 }
 0x318   : > { %vm1006_vm13 = vcmp.eq.f32.partialorder %v3256_v39, %v973_v26  ;;  %vm1007_vm14 = vcmp.eq.f32.partialorder %v3913_v43, %v973_v26  ;;  %v1269_v39 = vmul.f32 0.044715, %v3917_v30  ;;  %v1458_v26 = vadd.f32 1.0, %v2099_v63 }
 0x319   : > { %v1038_v32 = vsel %vm1006_vm13, %v2753_v48, 4.0  ;;  %v1039_v28 = vsel %vm1007_vm14, %v2755_v51, 4.0  ;;  %v2101_v0 = vpop.eup %2100  ;;  %v1235_v43 = vmul.f32 0.5, %v3915_v22  ;;  %v1338_v40 = vmul.f32 %v1306_v13, %v3922_v33 }
 0x31a   : > { %v1083_v20 = vmin.f32 %v1038_v32, %v1039_v28  ;;  %v1301_v1 = vmul.f32 %v1269_v39, %v3917_v30  ;;  %v1459_v32 = vadd.f32 1.0, %v2101_v0  ;;  %v1337_v28 = vmul.f32 %v1305_v31, %v3921_v41 }
 0x31b   : > { %v1368_v39 = vadd.f32 %v1336_v11, %v3920_v27  ;;  %v1490_v24 = vmul.f32 %v1458_v26, %v1234_v29  ;;  %v1370_v11 = vadd.f32 %v1338_v40, %v3922_v33  ;;  %v3926_v26 = vld [vmem:[#allocation29_spill] sm:$0xff]  ;;  %v3931_v40 = vld [vmem:[#allocation32_spill] sm:$0xff] }
 0x31c   : > { %1084 = vmin.xlane.f32.xlu1 %v1083_v20  ;;  %v1333_v10 = vmul.f32 %v1301_v1, %v3917_v30  ;;  %v2103_v20 = vpop.eup %2102  ;;  %v1491_v45 = vmul.f32 %v1459_v32, %v1235_v43  ;;  %v1369_v59 = vadd.f32 %v1337_v28, %v3921_v41  ;;  %v1276_v43 = vmul.f32 0.044715, %v3926_v26  ;;  %v3927_v32 = vld [vmem:[#allocation30_spill] sm:$0xff] }
 0x31d   : > { %v1460_v37 = vadd.f32 1.0, %v2103_v20  ;;  %v1522_v52 = vsel %vm2611_vm1, 1.0, %v1490_v24  ;;  %v1277_v28 = vmul.f32 0.044715, %v3927_v32 }
 0x31e   : > { %v1365_v38 = vadd.f32 %v1333_v10, %v3917_v30  ;;  %v1400_v10 = vmul.f32 0.7978846, %v1368_v39  ;;  %v3924_v30 = vld [vmem:[#allocation47_spill] sm:$0xff]  ;;  %v1401_v35 = vmul.f32 0.7978846, %v1369_v59  ;;  %v1523_v25 = vsel %vm2615_vm2, 1.0, %v1491_v45 }
 0x31f   : > { %v1492_v56 = vmul.f32 %v1460_v37, %v1236_v47 }
 0x320   : > { %v1397_v14 = vmul.f32 0.7978846, %v1365_v38 }
 0x322   : > { %2104 = vtanh.f32 %v1397_v14  ;;  %v1339_v14 = vmul.f32 %v1307_v9, %v3923_v60 }
 0x323   : > { %2106 = vtanh.f32 %v1398_v55 }
 0x324   : > { %2108 = vtanh.f32 %v1399_v21  ;;  %v1371_v29 = vadd.f32 %v1339_v14, %v3923_v60  ;;  %v1279_v14 = vmul.f32 0.044715, %v3931_v40 }
 0x325   : > { %2110 = vtanh.f32 %v1400_v10 }
 0x326   : > { %2112 = vtanh.f32 %v1401_v35 }
 0x328   : > { %v2105_v12 = vpop.eup %2104 }
 0x329   : > { %v2107_v61 = vpop.eup %2106  ;;  %v1461_v5 = vadd.f32 1.0, %v2105_v12 }
 0x32a   : > { %v2109_v22 = vpop.eup %2108  ;;  %v1462_v18 = vadd.f32 1.0, %v2107_v61 }
 0x32b   : > { %v1463_v34 = vadd.f32 1.0, %v2109_v22  ;;  %v1493_v58 = vmul.f32 %v1461_v5, %v1237_v49  ;;  %v2111_v59 = vpop.eup %2110  ;;  %v1524_v22 = vsel %vm2611_vm1, 1.0, %v1492_v56  ;;  %v1308_v49 = vmul.f32 %v1276_v43, %v3926_v26 }
 0x32c   : > { %v3537_v21 = vmul.f32 %v1462_v18, %v1238_v57  ;;  %v1309_v5 = vmul.f32 %v1277_v28, %v3927_v32  ;;  %v2113_v13 = vpop.eup %2112  ;;  %v1240_v18 = vmul.f32 0.5, %v3920_v27 }
 0x32d   : > { %v3539_v63 = vmul.f32 %v1463_v34, %v1239_v36  ;;  %v1464_v36 = vadd.f32 1.0, %v2111_v59  ;;  %v1340_v34 = vmul.f32 %v1308_v49, %v3926_v26 }
 0x32e   : > { %v1526_v10 = vsel %vm2611_vm1, 1.0, %v3537_v21  ;;  %v1341_v35 = vmul.f32 %v1309_v5, %v3927_v32 }
 0x35d   : > { %v1067_v1 = vpop.xlane.xlu1 %1066 }
 0x35e   : > { %vm1106_vm15 = vcmp.eq.f32.partialorder %v2753_v48, %v1067_v1  ;;  %vm1107_vm0 = vcmp.eq.f32.partialorder %v2755_v51, %v1067_v1  ;;  %v1525_v1 = vsel %vm2615_vm2, 1.0, %v1493_v58 }
 0x35f   : > { %v1951_v7 = vsel %vm1106_vm15, 1.0, %v3876_v2  ;;  %v1952_v19 = vsel %vm1107_vm0, 1.0, %v3876_v2 }
 0x360   : > { %v1202_v23 = vadd.f32 %v1951_v7, %v3924_v30  ;;  %v1203_v38 = vadd.f32 %v1952_v19, %v3925_v3  ;;  %v1527_v7 = vsel %vm2615_vm2, 1.0, %v3539_v63  ;;  %v1402_v19 = vmul.f32 0.7978846, %v1370_v11  ;;  %v3933_v11 = vld [vmem:[#allocation52_spill] sm:$0xff] }
 0x361   : > { %v1241_v30 = vmul.f32 0.5, %v3921_v41 }
 0x362   : > { %v1554_v4 = vmul.f32 %v1522_v52, %v1202_v23  ;;  %v1555_v55 = vmul.f32 %v1523_v25, %v1203_v38  ;;  %v1403_v23 = vmul.f32 0.7978846, %v1371_v29  ;;  %v3930_v52 = vld [vmem:[#allocation31_spill] sm:$0xff]  ;;  %2114 = vtanh.f32 %v1402_v19 }
 0x363   : > { %v1278_v25 = vmul.f32 0.044715, %v3930_v52 }
 0x364   : > { %1641 = vmatmul.f32.gmra.mxu2 %v1554_v4  ;;  %1706 = vmatmul.f32.gmra.mxu3 %v1555_v55  ;;  %2116 = vtanh.f32 %v1403_v23 }
 0x365   : > { %v976_v31 = vpop.xlane.xlu1 %975  ;;  %v1070_v0 = vpop.xlane.xlu0 %1069  ;;  %v1310_v43 = vmul.f32 %v1278_v25, %v3930_v52 }
 0x366   : > { %vm1008_vm3 = vcmp.eq.f32.partialorder %v3378_v17, %v976_v31  ;;  %vm1009_vm4 = vcmp.eq.f32.partialorder %v3383_v44, %v976_v31  ;;  %vm1108_vm5 = vcmp.eq.f32.partialorder %v2753_v48, %v1070_v0  ;;  %vm1109_vm6 = vcmp.eq.f32.partialorder %v2755_v51, %v1070_v0  ;;  %v3928_v17 = vld [vmem:[#allocation49_spill] sm:$0xff]  ;;  %v3929_v44 = vld [vmem:[#allocation50_spill] sm:$0xff]  ;;  %v3932_v31 = vld [vmem:[#allocation51_spill] sm:$0xff] }
 0x367   : > { %v1953_v20 = vsel %vm1108_vm5, 1.0, %v3876_v2  ;;  %v1954_v62 = vsel %vm1109_vm6, 1.0, %v3876_v2  ;;  %v1621_v15 = vpop.f32.mrf.mxu2  ;;  %v1686_v12 = vpop.f32.mrf.mxu3  ;;  %v1040_v39 = vsel %vm1008_vm3, %v2753_v48, 4.0  ;;  %v1041_v24 = vsel %vm1009_vm4, %v2755_v51, 4.0 }
 0x368   : > { %v1687_v61 = vadd.f32 %v1686_v12, %v1621_v15  ;;  %v1086_v45 = vmin.f32 %v1040_v39, %v1041_v24  ;;  %v1204_v47 = vadd.f32 %v1953_v20, %v3928_v17  ;;  %v1205_v37 = vadd.f32 %v1954_v62, %v3929_v44 }
 0x369   : > { %v1311_v62 = vmul.f32 %v1279_v14, %v3931_v40  ;;  %v1373_v15 = vadd.f32 %v1341_v35, %v3927_v32  ;;  %v1496_v39 = vmul.f32 %v1464_v36, %v1240_v18  ;;  %v1242_v18 = vmul.f32 0.5, %v3922_v33 }
 0x36a   : > { %1734 = vst [vmem:[%s3563_s20] sm:$0xff] %v1687_v61  ;;  %1087 = vmin.xlane.f32.xlu2 %v1086_v45  ;;  %v1556_v9 = vmul.f32 %v1524_v22, %v1204_v47  ;;  %v1557_v57 = vmul.f32 %v1525_v1, %v1205_v37  ;;  %v1342_v61 = vmul.f32 %v1310_v43, %v3930_v52  ;;  %v2115_v47 = vpop.eup %2114  ;;  %v1244_v43 = vmul.f32 0.5, %v3926_v26 }
 0x36b   : > { %v1343_v17 = vmul.f32 %v1311_v62, %v3931_v40  ;;  %v1405_v1 = vmul.f32 0.7978846, %v1373_v15  ;;  %v2117_v49 = vpop.eup %2116 }
 0x36c   : > { %1644 = vmatmul.f32.gmra.mxu2 %v1556_v9  ;;  %1709 = vmatmul.f32.gmra.mxu3 %v1557_v57  ;;  %v3935_v57 = vld [vmem:[#allocation54_spill] sm:$0xff]  ;;  %v1374_v36 = vadd.f32 %v1342_v61, %v3930_v52  ;;  %v1467_v35 = vadd.f32 1.0, %v2117_v49 }
 0x36d   : > { %v1073_v3 = vpop.xlane.xlu2 %1072  ;;  %v979_v38 = vpop.xlane.xlu0 %978 }
 0x36e   : > { %vm1110_vm7 = vcmp.eq.f32.partialorder %v2753_v48, %v1073_v3  ;;  %vm1111_vm8 = vcmp.eq.f32.partialorder %v2755_v51, %v1073_v3  ;;  %vm1010_vm9 = vcmp.eq.f32.partialorder %v3410_v8, %v979_v38  ;;  %vm1011_vm10 = vcmp.eq.f32.partialorder %v3413_v16, %v979_v38 }
 0x36f   : > { %v1955_v27 = vsel %vm1110_vm7, 1.0, %v3876_v2  ;;  %v1956_v41 = vsel %vm1111_vm8, 1.0, %v3876_v2  ;;  %v1042_v56 = vsel %vm1010_vm9, %v2753_v48, 4.0  ;;  %v1043_v58 = vsel %vm1011_vm10, %v2755_v51, 4.0 }
 0x370   : > { %v1624_v4 = vpop.f32.mrf.mxu2  ;;  %v1689_v55 = vpop.f32.mrf.mxu3  ;;  %v1089_v63 = vmin.f32 %v1042_v56, %v1043_v58  ;;  %v1206_v0 = vadd.f32 %v1955_v27, %v3932_v31  ;;  %v1207_v29 = vadd.f32 %v1956_v41, %v3933_v11  ;;  %v1465_v8 = vadd.f32 1.0, %v2113_v13  ;;  %v3934_v13 = vld [vmem:[#allocation53_spill] sm:$0xff]  ;;  %v3936_v31 = vld [vmem:[#allocation55_spill] sm:$0xff] }
 0x371   : > { %v1690_v21 = vadd.f32 %v1689_v55, %v1624_v4  ;;  %v1372_v16 = vadd.f32 %v1340_v34, %v3926_v26  ;;  %v1375_v3 = vadd.f32 %v1343_v17, %v3931_v40  ;;  %v1466_v38 = vadd.f32 1.0, %v2115_v47 }
 0x372   : > { %1090 = vmin.xlane.f32.xlu0 %v1089_v63  ;;  %v1558_v28 = vmul.f32 %v1526_v10, %v1206_v0  ;;  %v1559_v20 = vmul.f32 %v1527_v7, %v1207_v29  ;;  %v1497_v24 = vmul.f32 %v1465_v8, %v1241_v30  ;;  %v1528_v7 = vsel %vm2611_vm1, 1.0, %v1496_v39  ;;  %v3937_v29 = vld [vmem:[#allocation56_spill] sm:$0xff] }
 0x373   : > { %1735 = vst [vmem:[%s3563_s20 + $0x8] sm:$0xff] %v1690_v21  ;;  %v1404_v45 = vmul.f32 0.7978846, %v1372_v16  ;;  %v1243_v34 = vmul.f32 0.5, %v3923_v60  ;;  %v1406_v25 = vmul.f32 0.7978846, %v1374_v36  ;;  %v1498_v41 = vmul.f32 %v1466_v38, %v1242_v18 }
 0x374   : > { %1647 = vmatmul.f32.gmra.mxu2 %v1558_v28  ;;  %1712 = vmatmul.f32.gmra.mxu3 %v1559_v20  ;;  %v1529_v19 = vsel %vm2615_vm2, 1.0, %v1497_v24  ;;  %v1407_v14 = vmul.f32 0.7978846, %v1375_v3  ;;  %v1245_v20 = vmul.f32 0.5, %v3927_v32 }
 0x375   : > { %v1076_v12 = vpop.xlane.xlu1 %1075  ;;  %2118 = vtanh.f32 %v1404_v45  ;;  %v1499_v4 = vmul.f32 %v1467_v35, %v1243_v34  ;;  %v1530_v11 = vsel %vm2611_vm1, 1.0, %v1498_v41  ;;  %v3940_v35 = vld [vmem:[#allocation59_spill] sm:$0xff] }
 0x376   : > { %vm1112_vm11 = vcmp.eq.f32.partialorder %v2753_v48, %v1076_v12  ;;  %vm1113_vm12 = vcmp.eq.f32.partialorder %v2755_v51, %v1076_v12  ;;  %2120 = vtanh.f32 %v1405_v1  ;;  %v3938_v1 = vld [vmem:[#allocation57_spill] sm:$0xff] }
 0x377   : > { %v1957_v44 = vsel %vm1112_vm11, 1.0, %v3876_v2  ;;  %v1958_v37 = vsel %vm1113_vm12, 1.0, %v3876_v2  ;;  %2122 = vtanh.f32 %v1406_v25  ;;  %v1531_v16 = vsel %vm2615_vm2, 1.0, %v1499_v4 }
 0x378   : > { %v1627_v59 = vpop.f32.mrf.mxu2  ;;  %v1692_v22 = vpop.f32.mrf.mxu3  ;;  %v1208_v9 = vadd.f32 %v1957_v44, %v3934_v13  ;;  %v1209_v10 = vadd.f32 %v1958_v37, %v3935_v57  ;;  %2124 = vtanh.f32 %v1407_v14  ;;  %v3941_v14 = vld [vmem:[#allocation60_spill] sm:$0xff] }
 0x379   : > { %v1693_v5 = vadd.f32 %v1692_v22, %v1627_v59  ;;  %v1246_v59 = vmul.f32 0.5, %v3930_v52 }
 0x37a   : > { %v1560_v30 = vmul.f32 %v1528_v7, %v1208_v9  ;;  %v1561_v23 = vmul.f32 %v1529_v19, %v1209_v10  ;;  %v1247_v9 = vmul.f32 0.5, %v3931_v40 }
 0x37b   : > { %1736 = vst [vmem:[%s3563_s20 + $0x10] sm:$0xff] %v1693_v5  ;;  %v2119_v55 = vpop.eup %2118  ;;  %v3939_v5 = vld [vmem:[#allocation58_spill] sm:$0xff] }
 0x37c   : > { %1650 = vmatmul.f32.gmra.mxu2 %v1560_v30  ;;  %1715 = vmatmul.f32.gmra.mxu3 %v1561_v23  ;;  %v2121_v21 = vpop.eup %2120  ;;  %v1468_v28 = vadd.f32 1.0, %v2119_v55 }
 0x37d   : > { %v1469_v62 = vadd.f32 1.0, %v2121_v21  ;;  %v2123_v39 = vpop.eup %2122 }
 0x37e   : > { %v2125_v45 = vpop.eup %2124  ;;  %v1500_v44 = vmul.f32 %v1468_v28, %v1244_v43  ;;  %v1470_v22 = vadd.f32 1.0, %v2123_v39  ;;  %v3944_v43 = vld [vmem:[#allocation35_spill] sm:$0xff] }
 0x37f   : > { %v1079_v58 = vpop.xlane.xlu2 %1078  ;;  %v1501_v37 = vmul.f32 %v1469_v62, %v1245_v20  ;;  %v1471_v57 = vadd.f32 1.0, %v2125_v45  ;;  %v1282_v28 = vmul.f32 0.044715, %v3944_v43  ;;  %v3945_v20 = vld [vmem:[#allocation36_spill] sm:$0xff] }
 0x380   : > { %v1630_v27 = vpop.f32.mrf.mxu2  ;;  %v1695_v33 = vpop.f32.mrf.mxu3  ;;  %vm1114_vm13 = vcmp.eq.f32.partialorder %v2753_v48, %v1079_v58  ;;  %vm1115_vm14 = vcmp.eq.f32.partialorder %v2755_v51, %v1079_v58  ;;  %v1532_v10 = vsel %vm2611_vm1, 1.0, %v1500_v44  ;;  %v1502_v30 = vmul.f32 %v1470_v22, %v1246_v59 }
 0x381   : > { %v1696_v56 = vadd.f32 %v1695_v33, %v1630_v27  ;;  %v1959_v60 = vsel %vm1114_vm13, 1.0, %v3876_v2  ;;  %v1960_v63 = vsel %vm1115_vm14, 1.0, %v3876_v2  ;;  %v1533_v7 = vsel %vm2615_vm2, 1.0, %v1501_v37 }
 0x382   : > { %v1210_v0 = vadd.f32 %v1959_v60, %v3936_v31  ;;  %v1211_v8 = vadd.f32 %v1960_v63, %v3937_v29  ;;  %v1503_v23 = vmul.f32 %v1471_v57, %v1247_v9  ;;  %v1534_v33 = vsel %vm2611_vm1, 1.0, %v1502_v30  ;;  %v3942_v60 = vld [vmem:[#allocation33_spill] sm:$0xff]  ;;  %v3943_v31 = vld [vmem:[#allocation34_spill] sm:$0xff] }
 0x383   : > { %1737 = vst [vmem:[%s3563_s20 + $0x18] sm:$0xff] %v1696_v56  ;;  %v1280_v63 = vmul.f32 0.044715, %v3942_v60  ;;  %v1283_v62 = vmul.f32 0.044715, %v3945_v20  ;;  %v1314_v39 = vmul.f32 %v1282_v28, %v3944_v43 }
 0x384   : > { %v1562_v15 = vmul.f32 %v1530_v11, %v1210_v0  ;;  %v1563_v12 = vmul.f32 %v1531_v16, %v1211_v8  ;;  %v1535_v41 = vsel %vm2615_vm2, 1.0, %v1503_v23  ;;  %v1281_v0 = vmul.f32 0.044715, %v3943_v31 }
 0x385   : > { %v1312_v11 = vmul.f32 %v1280_v63, %v3942_v60 }
 0x386   : > { %1653 = vmatmul.f32.gmra.mxu2 %v1562_v15  ;;  %1718 = vmatmul.f32.gmra.mxu3 %v1563_v12  ;;  %v1313_v29 = vmul.f32 %v1281_v0, %v3943_v31 }
 0x387   : > { %v1082_v47 = vpop.xlane.xlu0 %1081  ;;  %v1344_v8 = vmul.f32 %v1312_v11, %v3942_v60 }
 0x388   : > { %v1633_v24 = vpop.f32.mrf.mxu2  ;;  %v1698_v61 = vpop.f32.mrf.mxu3  ;;  %vm1116_vm15 = vcmp.eq.f32.partialorder %v2753_v48, %v1082_v47  ;;  %vm1117_vm0 = vcmp.eq.f32.partialorder %v2755_v51, %v1082_v47  ;;  %v1345_v16 = vmul.f32 %v1313_v29, %v3943_v31 }
 0x389   : > { %v1699_v17 = vadd.f32 %v1698_v61, %v1633_v24  ;;  %v1961_v26 = vsel %vm1116_vm15, 1.0, %v3876_v2  ;;  %v1962_v32 = vsel %vm1117_vm0, 1.0, %v3876_v2  ;;  %v1376_v15 = vadd.f32 %v1344_v8, %v3942_v60 }
 0x38a   : > { %v1212_v49 = vadd.f32 %v1961_v26, %v3938_v1  ;;  %v1213_v13 = vadd.f32 %v1962_v32, %v3939_v5  ;;  %v1377_v12 = vadd.f32 %v1345_v16, %v3943_v31  ;;  %v1315_v24 = vmul.f32 %v1283_v62, %v3945_v20 }
 0x38b   : > { %1738 = vst [vmem:[%s3563_s20 + $0x20] sm:$0xff] %v1699_v17  ;;  %v1408_v61 = vmul.f32 0.7978846, %v1376_v15  ;;  %v1346_v17 = vmul.f32 %v1314_v39, %v3944_v43  ;;  %v1248_v1 = vmul.f32 0.5, %v3942_v60  ;;  %v1249_v5 = vmul.f32 0.5, %v3943_v31 }
 0x38c   : > { %v1564_v19 = vmul.f32 %v1532_v10, %v1212_v49  ;;  %v1565_v18 = vmul.f32 %v1533_v7, %v1213_v13  ;;  %v1409_v45 = vmul.f32 0.7978846, %v1377_v12  ;;  %v1347_v47 = vmul.f32 %v1315_v24, %v3945_v20 }
 0x38d   : > { %2126 = vtanh.f32 %v1408_v61  ;;  %v1378_v44 = vadd.f32 %v1346_v17, %v3944_v43 }
 0x38e   : > { %1656 = vmatmul.f32.gmra.mxu2 %v1564_v19  ;;  %1721 = vmatmul.f32.gmra.mxu3 %v1565_v18  ;;  %2128 = vtanh.f32 %v1409_v45  ;;  %v1379_v37 = vadd.f32 %v1347_v47, %v3945_v20 }
 0x38f   : > { %v1085_v52 = vpop.xlane.xlu1 %1084  ;;  %v1410_v26 = vmul.f32 0.7978846, %v1378_v44 }
 0x390   : > { %v1636_v36 = vpop.f32.mrf.mxu2  ;;  %vm1118_vm3 = vcmp.eq.f32.partialorder %v2753_v48, %v1085_v52  ;;  %vm1119_vm4 = vcmp.eq.f32.partialorder %v2755_v51, %v1085_v52  ;;  %v1701_v40 = vpop.f32.mrf.mxu3  ;;  %v1411_v59 = vmul.f32 0.7978846, %v1379_v37 }
 0x391   : > { %v1963_v3 = vsel %vm1118_vm3, 1.0, %v3876_v2  ;;  %v1964_v38 = vsel %vm1119_vm4, 1.0, %v3876_v2  ;;  %v1702_v34 = vadd.f32 %v1701_v40, %v1636_v36  ;;  %2130 = vtanh.f32 %v1410_v26 }
 0x392   : > { %v1214_v25 = vadd.f32 %v1963_v3, %v3940_v35  ;;  %v1215_v27 = vadd.f32 %v1964_v38, %v3941_v14  ;;  %2132 = vtanh.f32 %v1411_v59  ;;  %v1250_v3 = vmul.f32 0.5, %v3944_v43 }
 0x393   : > { %1739 = vst [vmem:[%s3563_s20 + $0x28] sm:$0xff] %v1702_v34  ;;  %v2127_v32 = vpop.eup %2126  ;;  %v1251_v34 = vmul.f32 0.5, %v3945_v20 }
 0x394   : > { %v1566_v4 = vmul.f32 %v1534_v33, %v1214_v25  ;;  %v1567_v55 = vmul.f32 %v1535_v41, %v1215_v27  ;;  %v2129_v22 = vpop.eup %2128  ;;  %v1472_v49 = vadd.f32 1.0, %v2127_v32 }
 0x395   : > { %v1473_v13 = vadd.f32 1.0, %v2129_v22 }
 0x396   : > { %1659 = vmatmul.f32.gmra.mxu2 %v1566_v4  ;;  %1724 = vmatmul.f32.gmra.mxu3 %v1567_v55  ;;  %v1504_v9 = vmul.f32 %v1472_v49, %v1248_v1 }
 0x397   : > { %v1505_v57 = vmul.f32 %v1473_v13, %v1249_v5  ;;  %v2131_v10 = vpop.eup %2130 }
 0x398   : > { %v1639_v56 = vpop.f32.mrf.mxu2  ;;  %v1704_v58 = vpop.f32.mrf.mxu3  ;;  %v1536_v23 = vsel %vm2611_vm1, 1.0, %v1504_v9  ;;  %v1474_v38 = vadd.f32 1.0, %v2131_v10 }
 0x399   : > { %v1705_v21 = vadd.f32 %v1704_v58, %v1639_v56  ;;  %v2133_v19 = vpop.eup %2132  ;;  %v1537_v40 = vsel %vm2615_vm2, 1.0, %v1505_v57 }
 0x39a   : > { %v1475_v35 = vadd.f32 1.0, %v2133_v19  ;;  %v1506_v27 = vmul.f32 %v1474_v38, %v1250_v3 }
 0x39b   : > { %1740 = vst [vmem:[%s3563_s20 + $0x30] sm:$0xff] %v1705_v21 }
 0x39c   : > { %v1538_v60 = vsel %vm2611_vm1, 1.0, %v1506_v27 }
 0x3dd   : > { %v1088_v7 = vpop.xlane.xlu2 %1087 }
 0x3de   : > { %vm1120_vm5 = vcmp.eq.f32.partialorder %v2753_v48, %v1088_v7  ;;  %vm1121_vm6 = vcmp.eq.f32.partialorder %v2755_v51, %v1088_v7 }
 0x3df   : > { %v1965_v18 = vsel %vm1120_vm5, 1.0, %v3876_v2  ;;  %v1966_v52 = vsel %vm1121_vm6, 1.0, %v3876_v2 }
 0x3e0   : > { %v1216_v36 = vadd.f32 %v1965_v18, %v3343_v46  ;;  %v1217_v30 = vadd.f32 %v1966_v52, %v3346_v6  ;;  %v1507_v6 = vmul.f32 %v1475_v35, %v1251_v34 }
 0x3e2   : > { %v1568_v25 = vmul.f32 %v1536_v23, %v1216_v36  ;;  %v1569_v14 = vmul.f32 %v1537_v40, %v1217_v30 }
 0x3e4   : > { %1662 = vmatmul.f32.gmra.mxu2 %v1568_v25  ;;  %1727 = vmatmul.f32.gmra.mxu3 %v1569_v14 }
 0x3e5   : > { %v1091_v46 = vpop.xlane.xlu0 %1090 }
 0x3e6   : > { %vm1122_vm7 = vcmp.eq.f32.partialorder %v2753_v48, %v1091_v46  ;;  %vm1123_vm8 = vcmp.eq.f32.partialorder %v2755_v51, %v1091_v46  ;;  %v1539_v48 = vsel %vm2615_vm2, 1.0, %v1507_v6 }
 0x3e7   : > { %v1967_v33 = vsel %vm1122_vm7, 1.0, %v3876_v2  ;;  %v1968_v41 = vsel %vm1123_vm8, 1.0, %v3876_v2  ;;  %v1642_v4 = vpop.f32.mrf.mxu2  ;;  %v1707_v55 = vpop.f32.mrf.mxu3 }
 0x3e8   : > { %v1218_v56 = vadd.f32 %v1967_v33, %v3370_v50  ;;  %v1219_v58 = vadd.f32 %v1968_v41, %v3373_v42  ;;  %v1708_v21 = vadd.f32 %v1707_v55, %v1642_v4 }
 0x3ea   : > { %1741 = vst [vmem:[%s3563_s20 + $0x38] sm:$0xff] %v1708_v21  ;;  %v1570_v51 = vmul.f32 %v1538_v60, %v1218_v56  ;;  %v1571_v63 = vmul.f32 %v1539_v48, %v1219_v58 }
 0x3ec   : > { %1665 = vmatmul.f32.gmra.mxu2 %v1570_v51  ;;  %1730 = vmatmul.f32.gmra.mxu3 %v1571_v63 }
 0x3ef   : > { %v1645_v2 = vpop.f32.mrf.mxu2  ;;  %v1710_v31 = vpop.f32.mrf.mxu3 }
 0x3f0   : > { %v1711_v50 = vadd.f32 %v1710_v31, %v1645_v2 }
 0x3f2   : > { %1742 = vst [vmem:[%s3563_s20 + $0x40] sm:$0xff] %v1711_v50 }
 0x3f7   : > { %v1648_v42 = vpop.f32.mrf.mxu2  ;;  %v1713_v0 = vpop.f32.mrf.mxu3 }
 0x3f8   : > { %v1714_v11 = vadd.f32 %v1713_v0, %v1648_v42 }
 0x3fa   : > { %1743 = vst [vmem:[%s3563_s20 + $0x48] sm:$0xff] %v1714_v11 }
 0x3ff   : > { %v1651_v53 = vpop.f32.mrf.mxu2  ;;  %v1716_v54 = vpop.f32.mrf.mxu3 }
 0x400   : > { %v1717_v29 = vadd.f32 %v1716_v54, %v1651_v53 }
 0x402   : > { %1744 = vst [vmem:[%s3563_s20 + $0x50] sm:$0xff] %v1717_v29 }
 0x409   : > { %v1654_v8 = vpop.f32.mrf.mxu2  ;;  %v1719_v16 = vpop.f32.mrf.mxu3 }
 0x40a   : > { %v1720_v43 = vadd.f32 %v1719_v16, %v1654_v8 }
 0x40c   : > { %1745 = vst [vmem:[%s3563_s20 + $0x58] sm:$0xff] %v1720_v43 }
 0x411   : > { %v1657_v28 = vpop.f32.mrf.mxu2  ;;  %v1722_v20 = vpop.f32.mrf.mxu3 }
 0x412   : > { %v1723_v62 = vadd.f32 %v1722_v20, %v1657_v28 }
 0x414   : > { %1746 = vst [vmem:[%s3563_s20 + $0x60] sm:$0xff] %v1723_v62 }
 0x419   : > { %v1660_v15 = vpop.f32.mrf.mxu2  ;;  %v1725_v12 = vpop.f32.mrf.mxu3 }
 0x41a   : > { %v1726_v39 = vadd.f32 %v1725_v12, %v1660_v15 }
 0x41c   : > { %1747 = vst [vmem:[%s3563_s20 + $0x68] sm:$0xff] %v1726_v39 }
 0x467   : > { %v1663_v24 = vpop.f32.mrf.mxu2  ;;  %v1728_v61 = vpop.f32.mrf.mxu3 }
 0x468   : > { %v1729_v45 = vadd.f32 %v1728_v61, %v1663_v24 }
 0x46a   : > { %1748 = vst [vmem:[%s3563_s20 + $0x70] sm:$0xff] %v1729_v45 }
 0x46e   : > { %1757 = sbr.rel (!%p2483_p11) target bundleno = 1170 (0x492), region = 68 }
 0x46f   : > { %v1666_v17 = vpop.f32.mrf.mxu2  ;;  %v1731_v47 = vpop.f32.mrf.mxu3 }
 0x470   : > { %v1732_v44 = vadd.f32 %v1731_v47, %v1666_v17 }
 0x472   : > { %1749 = vst [vmem:[%s3563_s20 + $0x78] sm:$0xff] %v1732_v44 }
 0x473   : > { %s3957_s16 = smov (!%p1760_p6, %s1759_s16), 16 }
 0x474   : > { %s1971_s26 = sshll.u32 %s3957_s16, 3 }
 0x475   : > { %s1763_s28 = ssub.s32 128, %s1971_s26 }
 0x476   : > { %s1764_s15 = sshll.u32 %s1763_s28, 4 }
 0x477   : > { %1765 = vsyncadd %s1751_s12, %s1764_s15  ;;  %p3706_p5 = scmp.ne.s32.totalorder %s1971_s26, 0  ;;  %s1979_s18 = sshll.u32 %s2452_s25, 7 }
 0x478   : > { %s1768_s17 = scalar_lea.hbm %s3766_s6, %s1979_s18  ;;  %s1770_s1 = sshll.u32 %s3563_s20, 4  ;;  %s3715_s1 = int_to_ptr.vmem [resolvable:$true] %s1770_s1 }
 0x479   : > { %s1772_s30 = sshll.u32 %s1768_s17, 4  ;;  %s1975_s27 = sshll.u32 %s3957_s16, 7  ;;  %s3717_s30 = int_to_ptr.hbm [resolvable:$true] %s1772_s30 }
 0x47a   : > { %s2293_s29 = sshra.s32 %s3715_s1, 4  ;;  %s2295_s13 = sshrl.u32 %s1975_s27, 4  ;;  %s2294_s29 = int_to_ptr.vmem [resolvable:$true] %s2293_s29 }
 0x47b   : > { %s2300_s8 = scalar_lea.vmem %s2294_s29, %s2295_s13  ;;  %s2393_s25 = smov [#allocation11]  }
 0x47c   : > { %p2301_p11 = scmp.ne.s32.totalorder %s2294_s29, %s2300_s8  ;;  %s2304_s11 = scalar_lea.vmem %s2393_s25, 256 }
 0x47d   : > { %p2306_p1 = scmp.lt.s32.totalorder %s2304_s11, %s2300_s8 }
 0x47e   : > { %p2302_p9 = pnand %p2301_p11, %p3706_p5 }
 0x480   : > { %p2303_p10 = pneg %p2302_p9 }
 0x482   : > { %p2308_p0 = pnand %p2306_p1, %p2303_p10 }
 0x484   : > { %2311 = shalt.err (!%p2308_p0)
}
 0x485   : > { %s2312_s20 = sshra.s32 %s3717_s30, 4  ;;  %s2323_s15 = scalar_lea.hbm %s3766_s6, 160  ;;  %s2313_s20 = int_to_ptr.hbm [resolvable:$true] %s2312_s20 }
 0x486   : > { %s2319_s7 = scalar_lea.hbm %s2313_s20, %s2295_s13  ;;  %p2324_p4 = scmp.lt.s32.totalorder %s2313_s20, %s3766_s6 }
 0x487   : > { %p2320_p3 = scmp.ne.s32.totalorder %s2313_s20, %s2319_s7  ;;  %p2325_p12 = scmp.lt.s32.totalorder %s2323_s15, %s2319_s7 }
 0x489   : > { %p2321_p7 = pnand %p2320_p3, %p3706_p5  ;;  %p2326_p13 = por %p2325_p12, %p2324_p4 }
 0x48b   : > { %p2322_p8 = pneg %p2321_p7 }
 0x48d   : > { %p2327_p2 = pnand %p2326_p13, %p2322_p8 }
 0x48f   : > { %2330 = shalt.err (!%p2327_p2)
}
 0x490   : > { %s2394_s14 = smov 128   ;;  %s2395_s17 = smov 8  }
 0x491   : > { %1778 = dma.vmem_to_hbm [thread:$0]  (%p3706_p5), %s3715_s1, %s1975_s27, %s3717_s30, %s1751_s12, %s2394_s14, %s2394_s14, %s2395_s17  }
 0x492 PF: > { %s1787_s29 = sand.u32 1, %s2366_s21   ;;  %p3947_p6 = scmp.ne.s32.totalorder %s3843_s10, 0 }
 0x493   : > { %p3948_p11 = scmp.ge.s32.totalorder %s2378_s24, 2  ;;  %s1788_s13 = scalar_lea.sflag [#allocation4], %s1787_s29 }
 0x495   : > { %p2012_p9 = pnand %p3948_p11, %p3947_p6 }
 0x497   : > { %p2013_p10 = pneg %p2012_p9 }
 0x499   : > { %2361 = dma.done.wait (%p2013_p10), %s1788_s13, 2048  }
 0x49a   : > { %2363 = vsyncadd (%p2013_p10), %s1788_s13, 4294965248  ;;  %s3949_s24 = sld [smem:[#allocation16_spill]]  ;;  %s3951_s21 = smov %s2370_s22 }
 0x49b   : > { %s3950_s9 = sld [smem:[#allocation17_spill]]  ;;  %s3952_s22 = smov %s2374_s23 }
 0x4a0   : > { %p21_p1 = scmp.ge.s32.totalorder %s3949_s24, 4  }
 0x4a1   : > { %s3953_s23 = smov %s3950_s9 }
 0x4a2   :  { %23 = sbr.rel (!%p21_p1) target bundleno = 10 (0xa), region = 105 }
 0x4a7   :  { %1794 = vsyncpa [#allocation3], 1 }
 0x4a8   :  { %1796 = vsyncpa [#allocation3 + $0x1], 1 }
 0x4a9   :  { %1797 = vsyncpa [#allocation6], 1 }
 0x4aa   :  { %1798 = vsyncpa [#allocation9], 1 }
 0x4ab   :  { %1799 = vsyncpa [#allocation4], 1 }
 0x4ac   :  { %1801 = vsyncpa [#allocation4 + $0x1], 1 }

</bundles_post_ra>
